<compile_context>
chip_gen: v5e
topology: v5e:2x2
jax: 0.10.0
libtpu: 0.0.40
codegen_flags: <defaults>
</compile_context>

<pallas_src>
import functools
import math

import jax
import jax.numpy as jnp
from jax.experimental import pallas as pl
from jax.experimental.pallas import tpu as pltpu


_BN_EPS = 1e-5


# ----------------------------------------------------------------------------
# Fused Pallas kernel: entire create_mse forward for one (batch*row) slab.
# ----------------------------------------------------------------------------

def _mse_fused_kernel(x_ref, wd_ref, sd_ref, bd_ref, w1_ref, b1_ref,
                      w2_ref, s2_ref, b2_ref, o_ref,
                      xpad_ref, colx_ref, ccpad_ref, col1_ref, y1pad_ref, col2_ref,
                      *, K, dils, L, Cin, FF, PADX, PADF):
    ND = len(dils)
    C1 = ND * FF          # channels into feature[0]
    C2 = 2 * FF           # channels into feature[1]
    p1 = (K - 1) // 2     # 'same' left pad for the dilation-1 feature convs

    def zero_margins(ref, pad):
        rows, cols = ref.shape
        tail = cols - pad - L
        ref[:, pl.ds(0, pad)] = jnp.zeros((rows, pad), jnp.float32)
        ref[:, pl.ds(pad + L, tail)] = jnp.zeros((rows, tail), jnp.float32)

    # ---- Stage 0: place the input in a zero-margined VMEM slab ('same' padding done
    #      in-kernel; all stores below land on lane-tile-aligned regions). ----
    zero_margins(xpad_ref, PADX)
    zero_margins(ccpad_ref, PADF)
    zero_margins(y1pad_ref, PADF)
    xpad_ref[:, pl.ds(PADX, L)] = x_ref[...]

    # ---- Stage 1: the ND dilated Conv+BN branches (creat_bn_conv x4), written straight
    #      into the concatenated slab (no HBM concat).  One K*Cin-contraction matmul each.
    for i, d in enumerate(dils):
        pad_l = d * (K - 1) // 2
        for k in range(K):
            start = PADX - pad_l + k * d
            colx_ref[pl.ds(k * Cin, Cin), :] = xpad_ref[:, pl.ds(start, L)]
        acc = jnp.dot(wd_ref[i], colx_ref[...], preferred_element_type=jnp.float32)
        ccpad_ref[pl.ds(i * FF, FF), pl.ds(PADF, L)] = acc * sd_ref[i] + bd_ref[i]

    # ---- Stage 2: feature[0] = Conv(ND*FF -> 2*FF, k, 'same') + bias (no BN, no act). ----
    for k in range(K):
        col1_ref[pl.ds(k * C1, C1), :] = ccpad_ref[:, pl.ds(PADF - p1 + k, L)]
    y1 = jnp.dot(w1_ref[...], col1_ref[...], preferred_element_type=jnp.float32) + b1_ref[...]
    y1pad_ref[:, pl.ds(PADF, L)] = y1

    # ---- Stage 3: feature[1] = Conv(2*FF -> FF, k, 'same') + bias, then folded BatchNorm. --
    for k in range(K):
        col2_ref[pl.ds(k * C2, C2), :] = y1pad_ref[:, pl.ds(PADF - p1 + k, L)]
    y2 = jnp.dot(w2_ref[...], col2_ref[...], preferred_element_type=jnp.float32)
    o_ref[...] = (y2 * s2_ref[...] + b2_ref[...]).astype(o_ref.dtype)


# ----------------------------------------------------------------------------
# pallas_call builder (cached per shape signature) + jitted forward wrapper
# ----------------------------------------------------------------------------

def _round_up(v, m):
    return ((v + m - 1) // m) * m


_CALL_CACHE = {}


def _build_mse_call(N, Cin, L, K, dils, FF):
    key = (N, Cin, L, K, dils, FF)
    if key in _CALL_CACHE:
        return _CALL_CACHE[key]

    ND = len(dils)
    C1 = ND * FF
    C2 = 2 * FF
    need_x = max(d * (K - 1) for d in dils)            # widest 'same' padding needed
    PADX = max(_round_up(need_x, 128), 128)            # lane-tile aligned zero margin
    PADF = max(_round_up(K - 1, 128), 128)

    kern = functools.partial(_mse_fused_kernel, K=K, dils=tuple(dils), L=L,
                             Cin=Cin, FF=FF, PADX=PADX, PADF=PADF)
    fn = pl.pallas_call(
        kern,
        out_shape=jax.ShapeDtypeStruct((N, FF, L), jnp.float32),
        grid=(N,),
        in_specs=[
            pl.BlockSpec((None, Cin, L), lambda b: (b, 0, 0)),      # x slab
            pl.BlockSpec((ND, FF, K * Cin), lambda b: (0, 0, 0)),   # packed dilated weights
            pl.BlockSpec((ND, FF, 1), lambda b: (0, 0, 0)),         # folded BN scales
            pl.BlockSpec((ND, FF, 1), lambda b: (0, 0, 0)),         # folded BN biases
            pl.BlockSpec((C2, K * C1), lambda b: (0, 0)),           # feature[0] packed weight
            pl.BlockSpec((C2, 1), lambda b: (0, 0)),                # feature[0] bias
            pl.BlockSpec((FF, K * C2), lambda b: (0, 0)),           # feature[1] packed weight
            pl.BlockSpec((FF, 1), lambda b: (0, 0)),                # feature[1]+BN folded scale
            pl.BlockSpec((FF, 1), lambda b: (0, 0)),                # feature[1]+BN folded bias
        ],
        out_specs=pl.BlockSpec((None, FF, L), lambda b: (b, 0, 0)),  # lane-dense output slab
        scratch_shapes=[
            pltpu.VMEM((Cin, L + 2 * PADX), jnp.float32),   # zero-margined input
            pltpu.VMEM((K * Cin, L), jnp.float32),          # im2col slab, dilated branches
            pltpu.VMEM((C1, L + 2 * PADF), jnp.float32),    # concat slab (zero-margined)
            pltpu.VMEM((K * C1, L), jnp.float32),           # im2col slab, feature[0]
            pltpu.VMEM((C2, L + 2 * PADF), jnp.float32),    # feature[0] out (zero-margined)
            pltpu.VMEM((K * C2, L), jnp.float32),           # im2col slab, feature[1]
        ],
        compiler_params=pltpu.CompilerParams(
            dimension_semantics=("parallel",),              # keep both v7x TensorCores busy
        ),
    )
    _CALL_CACHE[key] = fn
    return fn


def create_mse_forward(x, w, *, K, dils, FF):
    """x: (B, Cin, H, W) exactly like the PyTorch module; returns (B, FF, H, W)."""
    B, Cin, H, W = x.shape
    ND = len(dils)
    xr = jnp.moveaxis(x, 2, 1).reshape(B * H, Cin, W)       # rows are independent 1-D convs
    wd = w["wd"].reshape(ND, FF, K * Cin)                   # row order = k*Cin + c (im2col)
    w1 = w["w1"].reshape(2 * FF, K * ND * FF)
    w2 = w["w2"].reshape(FF, K * 2 * FF)
    fn = _build_mse_call(B * H, Cin, W, K, tuple(dils), FF)
    y = fn(xr, wd, w["sd"], w["bd"], w1, w["b1"], w2, w["s2"], w["b2"])
    return jnp.moveaxis(y.reshape(B, H, FF, W), 1, 2)


# ----------------------------------------------------------------------------
# Pure-JAX reference (same folded-BN convention) for verification
# ----------------------------------------------------------------------------

def _conv1d_same_ref(x, w_okc, bias, dil):
    # x: (N, Cin, L); w_okc: (Cout, K, Cin) -- same packing convention as the kernel.
    Cout, K, Cin = w_okc.shape
    w_oik = jnp.transpose(w_okc, (0, 2, 1))
    total = dil * (K - 1)
    lo = total // 2
    y = jax.lax.conv_general_dilated(
        x, w_oik, window_strides=(1,), padding=[(lo, total - lo)],
        rhs_dilation=(dil,), dimension_numbers=("NCH", "OIH", "NCH"),
        precision=jax.lax.Precision.HIGHEST)
    return y + bias[None]


def create_mse_reference(x, w, *, K, dils, FF):
    B, Cin, H, W = x.shape
    xr = jnp.moveaxis(x, 2, 1).reshape(B * H, Cin, W)
    zero_ff = jnp.zeros((FF, 1), jnp.float32)
    branches = []
    for i, d in enumerate(dils):
        c = _conv1d_same_ref(xr, w["wd"][i], zero_ff, d)
        branches.append(c * w["sd"][i][None] + w["bd"][i][None])
    cc = jnp.concatenate(branches, axis=1)
    y1 = _conv1d_same_ref(cc, w["w1"], w["b1"], 1)
    y2 = _conv1d_same_ref(y1, w["w2"], zero_ff, 1)
    y2 = y2 * w["s2"][None] + w["b2"][None]
    return jnp.moveaxis(y2.reshape(B, H, FF, W), 1, 2)


# ----------------------------------------------------------------------------
# Deterministic synthetic parameters (mirror create_mse.__init__; BN folded, eval stats)
# ----------------------------------------------------------------------------

def make_params(key, cin, ff, K, dils):
    ND = len(dils)
    ks = jax.random.split(key, 6)
    bn_scale = 1.0 / math.sqrt(1.0 + _BN_EPS)   # gamma=1, beta=0, mean=0, var=1 (running stats)

    wd = jax.random.normal(ks[0], (ND, ff, K, cin), jnp.float32) / math.sqrt(K * cin)
    bd_conv = jax.random.normal(ks[1], (ND, ff), jnp.float32) * 0.1
    sd = jnp.full((ND, ff, 1), bn_scale, jnp.float32)
    bd = (bd_conv * bn_scale)[..., None]

    w1 = jax.random.normal(ks[2], (2 * ff, K, ND * ff), jnp.float32) / math.sqrt(K * ND * ff)
    b1 = (jax.random.normal(ks[3], (2 * ff,), jnp.float32) * 0.1)[:, None]

    w2 = jax.random.normal(ks[4], (ff, K, 2 * ff), jnp.float32) / math.sqrt(K * 2 * ff)
    b2_conv = jax.random.normal(ks[5], (ff,), jnp.float32) * 0.1
    s2 = jnp.full((ff, 1), bn_scale, jnp.float32)
    b2 = (b2_conv * bn_scale)[:, None]

    return {"wd": wd, "sd": sd, "bd": bd, "w1": w1, "b1": b1,
            "w2": w2, "s2": s2, "b2": b2}


# ----------------------------------------------------------------------------
# main
# ----------------------------------------------------------------------------

if __name__ == "__main__":
    # Shapes mirror the parent model's mse3 instance: create_mse(input=8, final_filter=16,
    # kernel=5, dilation_rates=[1,2,3,4]); W picked as a lane-dense multiple of 128, H=1.
    B, CIN, H, W = 2, 8, 1, 256
    FF, KERNEL, DILS = 16, 5, (1, 2, 3, 4)

    k_w, k_x = jax.random.split(jax.random.PRNGKey(0))
    weights = make_params(k_w, CIN, FF, KERNEL, DILS)
    x = jax.random.normal(k_x, (B, CIN, H, W), jnp.float32)

    fwd = jax.jit(functools.partial(create_mse_forward, K=KERNEL, dils=DILS, FF=FF))
    y = jax.block_until_ready(fwd(x, weights))
    assert y.shape == (B, FF, H, W), y.shape
    assert bool(jnp.all(jnp.isfinite(y)))

    y_ref = jax.block_until_ready(
        create_mse_reference(x, weights, K=KERNEL, dils=DILS, FF=FF))
    denom = float(jnp.max(jnp.abs(y_ref))) + 1e-6
    rel_err = float(jnp.max(jnp.abs(y - y_ref))) / denom
    assert rel_err < 2e-2, f"relative err {rel_err}"

    print("KERNEL_OK")
</pallas_src>

<mosaic_0001>
module attributes {stable_mosaic.version = 11 : i64} {
  func.func @_mse_fused_kernel(%arg0: i32, %arg1: memref<1x8x256xf32, #tpu.memory_space<vmem>>, %arg2: memref<4x16x40xf32, #tpu.memory_space<vmem>>, %arg3: memref<4x16x1xf32, #tpu.memory_space<vmem>>, %arg4: memref<4x16x1xf32, #tpu.memory_space<vmem>>, %arg5: memref<32x320xf32, #tpu.memory_space<vmem>>, %arg6: memref<32x1xf32, #tpu.memory_space<vmem>>, %arg7: memref<16x160xf32, #tpu.memory_space<vmem>>, %arg8: memref<16x1xf32, #tpu.memory_space<vmem>>, %arg9: memref<16x1xf32, #tpu.memory_space<vmem>>, %arg10: memref<1x16x256xf32, #tpu.memory_space<vmem>>, %arg11: memref<8x512xf32, #tpu.memory_space<vmem>>, %arg12: memref<40x256xf32, #tpu.memory_space<vmem>>, %arg13: memref<64x512xf32, #tpu.memory_space<vmem>>, %arg14: memref<320x256xf32, #tpu.memory_space<vmem>>, %arg15: memref<32x512xf32, #tpu.memory_space<vmem>>, %arg16: memref<160x256xf32, #tpu.memory_space<vmem>>) attributes {dimension_semantics = [#tpu.dimension_semantics<parallel>], iteration_bounds = array<i64: 2>, scalar_prefetch = 0 : i64, scratch_operands = 6 : i64, tpu.core_type = #tpu.core_type<tc>, window_params = [{transform_indices = @transform_0, window_bounds = array<i64: 1, 8, 256>}, {pipeline_mode = #tpu.pipeline_mode<synchronous>, transform_indices = @transform_1, window_bounds = array<i64: 4, 16, 40>}, {pipeline_mode = #tpu.pipeline_mode<synchronous>, transform_indices = @transform_2, window_bounds = array<i64: 4, 16, 1>}, {pipeline_mode = #tpu.pipeline_mode<synchronous>, transform_indices = @transform_3, window_bounds = array<i64: 4, 16, 1>}, {pipeline_mode = #tpu.pipeline_mode<synchronous>, transform_indices = @transform_4, window_bounds = array<i64: 32, 320>}, {pipeline_mode = #tpu.pipeline_mode<synchronous>, transform_indices = @transform_5, window_bounds = array<i64: 32, 1>}, {pipeline_mode = #tpu.pipeline_mode<synchronous>, transform_indices = @transform_6, window_bounds = array<i64: 16, 160>}, {pipeline_mode = #tpu.pipeline_mode<synchronous>, transform_indices = @transform_7, window_bounds = array<i64: 16, 1>}, {pipeline_mode = #tpu.pipeline_mode<synchronous>, transform_indices = @transform_8, window_bounds = array<i64: 16, 1>}, {transform_indices = @transform_9, window_bounds = array<i64: 1, 16, 256>}]} {
    %cst = arith.constant 0.000000e+00 : f32
    %0 = vector.broadcast %cst : f32 to vector<8x128xf32>
    %c0 = arith.constant 0 : index
    %c0_0 = arith.constant 0 : index
    %1 = vector.load %arg11[%c0, %c0_0] : memref<8x512xf32, #tpu.memory_space<vmem>>, vector<8x128xf32>
    tpu.vector_store %arg11[%c0, %c0_0], %0 {strides = array<i32>} : memref<8x512xf32, #tpu.memory_space<vmem>>, vector<8x128xf32>,
    %cst_1 = arith.constant 0.000000e+00 : f32
    %2 = vector.broadcast %cst_1 : f32 to vector<8x128xf32>
    %c0_2 = arith.constant 0 : index
    %c384 = arith.constant 384 : index
    %3 = vector.load %arg11[%c0_2, %c384] : memref<8x512xf32, #tpu.memory_space<vmem>>, vector<8x128xf32>
    tpu.vector_store %arg11[%c0_2, %c384], %2 {strides = array<i32>} : memref<8x512xf32, #tpu.memory_space<vmem>>, vector<8x128xf32>,
    %cst_3 = arith.constant 0.000000e+00 : f32
    %4 = vector.broadcast %cst_3 : f32 to vector<64x128xf32>
    %c0_4 = arith.constant 0 : index
    %c0_5 = arith.constant 0 : index
    %5 = vector.load %arg13[%c0_4, %c0_5] : memref<64x512xf32, #tpu.memory_space<vmem>>, vector<64x128xf32>
    tpu.vector_store %arg13[%c0_4, %c0_5], %4 {strides = array<i32>} : memref<64x512xf32, #tpu.memory_space<vmem>>, vector<64x128xf32>,
    %cst_6 = arith.constant 0.000000e+00 : f32
    %6 = vector.broadcast %cst_6 : f32 to vector<64x128xf32>
    %c0_7 = arith.constant 0 : index
    %c384_8 = arith.constant 384 : index
    %7 = vector.load %arg13[%c0_7, %c384_8] : memref<64x512xf32, #tpu.memory_space<vmem>>, vector<64x128xf32>
    tpu.vector_store %arg13[%c0_7, %c384_8], %6 {strides = array<i32>} : memref<64x512xf32, #tpu.memory_space<vmem>>, vector<64x128xf32>,
    %cst_9 = arith.constant 0.000000e+00 : f32
    %8 = vector.broadcast %cst_9 : f32 to vector<32x128xf32>
    %c0_10 = arith.constant 0 : index
    %c0_11 = arith.constant 0 : index
    %9 = vector.load %arg15[%c0_10, %c0_11] : memref<32x512xf32, #tpu.memory_space<vmem>>, vector<32x128xf32>
    tpu.vector_store %arg15[%c0_10, %c0_11], %8 {strides = array<i32>} : memref<32x512xf32, #tpu.memory_space<vmem>>, vector<32x128xf32>,
    %cst_12 = arith.constant 0.000000e+00 : f32
    %10 = vector.broadcast %cst_12 : f32 to vector<32x128xf32>
    %c0_13 = arith.constant 0 : index
    %c384_14 = arith.constant 384 : index
    %11 = vector.load %arg15[%c0_13, %c384_14] : memref<32x512xf32, #tpu.memory_space<vmem>>, vector<32x128xf32>
    tpu.vector_store %arg15[%c0_13, %c384_14], %10 {strides = array<i32>} : memref<32x512xf32, #tpu.memory_space<vmem>>, vector<32x128xf32>,
    %c0_15 = arith.constant 0 : index
    %c0_16 = arith.constant 0 : index
    %c0_17 = arith.constant 0 : index
    %12 = vector.load %arg1[%c0_15, %c0_16, %c0_17] : memref<1x8x256xf32, #tpu.memory_space<vmem>>, vector<1x8x256xf32>
    %13 = vector.shape_cast %12 : vector<1x8x256xf32> to vector<8x256xf32>
    %c0_18 = arith.constant 0 : index
    %c128 = arith.constant 128 : index
    %14 = vector.load %arg11[%c0_18, %c128] : memref<8x512xf32, #tpu.memory_space<vmem>>, vector<8x256xf32>
    tpu.vector_store %arg11[%c0_18, %c128], %13 {strides = array<i32>} : memref<8x512xf32, #tpu.memory_space<vmem>>, vector<8x256xf32>,
    %c0_19 = arith.constant 0 : index
    %c126 = arith.constant 126 : index
    %15 = vector.load %arg11[%c0_19, %c126] : memref<8x512xf32, #tpu.memory_space<vmem>>, vector<8x256xf32>
    %c0_20 = arith.constant 0 : index
    %c0_21 = arith.constant 0 : index
    %16 = vector.load %arg12[%c0_20, %c0_21] : memref<40x256xf32, #tpu.memory_space<vmem>>, vector<8x256xf32>
    tpu.vector_store %arg12[%c0_20, %c0_21], %15 {strides = array<i32>} : memref<40x256xf32, #tpu.memory_space<vmem>>, vector<8x256xf32>,
    %c0_22 = arith.constant 0 : index
    %c127 = arith.constant 127 : index
    %17 = vector.load %arg11[%c0_22, %c127] : memref<8x512xf32, #tpu.memory_space<vmem>>, vector<8x256xf32>
    %c8 = arith.constant 8 : index
    %c0_23 = arith.constant 0 : index
    %18 = vector.load %arg12[%c8, %c0_23] : memref<40x256xf32, #tpu.memory_space<vmem>>, vector<8x256xf32>
    tpu.vector_store %arg12[%c8, %c0_23], %17 {strides = array<i32>} : memref<40x256xf32, #tpu.memory_space<vmem>>, vector<8x256xf32>,
    %c0_24 = arith.constant 0 : index
    %c128_25 = arith.constant 128 : index
    %19 = vector.load %arg11[%c0_24, %c128_25] : memref<8x512xf32, #tpu.memory_space<vmem>>, vector<8x256xf32>
    %c16 = arith.constant 16 : index
    %c0_26 = arith.constant 0 : index
    %20 = vector.load %arg12[%c16, %c0_26] : memref<40x256xf32, #tpu.memory_space<vmem>>, vector<8x256xf32>
    tpu.vector_store %arg12[%c16, %c0_26], %19 {strides = array<i32>} : memref<40x256xf32, #tpu.memory_space<vmem>>, vector<8x256xf32>,
    %c0_27 = arith.constant 0 : index
    %c129 = arith.constant 129 : index
    %21 = vector.load %arg11[%c0_27, %c129] : memref<8x512xf32, #tpu.memory_space<vmem>>, vector<8x256xf32>
    %c24 = arith.constant 24 : index
    %c0_28 = arith.constant 0 : index
    %22 = vector.load %arg12[%c24, %c0_28] : memref<40x256xf32, #tpu.memory_space<vmem>>, vector<8x256xf32>
    tpu.vector_store %arg12[%c24, %c0_28], %21 {strides = array<i32>} : memref<40x256xf32, #tpu.memory_space<vmem>>, vector<8x256xf32>,
    %c0_29 = arith.constant 0 : index
    %c130 = arith.constant 130 : index
    %23 = vector.load %arg11[%c0_29, %c130] : memref<8x512xf32, #tpu.memory_space<vmem>>, vector<8x256xf32>
    %c32 = arith.constant 32 : index
    %c0_30 = arith.constant 0 : index
    %24 = vector.load %arg12[%c32, %c0_30] : memref<40x256xf32, #tpu.memory_space<vmem>>, vector<8x256xf32>
    tpu.vector_store %arg12[%c32, %c0_30], %23 {strides = array<i32>} : memref<40x256xf32, #tpu.memory_space<vmem>>, vector<8x256xf32>,
    %c0_31 = arith.constant 0 : index
    %c0_32 = arith.constant 0 : index
    %c0_33 = arith.constant 0 : index
    %25 = vector.load %arg2[%c0_31, %c0_32, %c0_33] : memref<4x16x40xf32, #tpu.memory_space<vmem>>, vector<1x16x40xf32>
    %26 = vector.shape_cast %25 : vector<1x16x40xf32> to vector<16x40xf32>
    %c0_34 = arith.constant 0 : index
    %c0_35 = arith.constant 0 : index
    %27 = vector.load %arg12[%c0_34, %c0_35] : memref<40x256xf32, #tpu.memory_space<vmem>>, vector<40x256xf32>
    %cst_36 = arith.constant dense<0.000000e+00> : vector<16x256xf32>
    %28 = tpu.matmul %26, %27, %cst_36 {dimension_numbers = #tpu.dot_dimension_numbers<[1], [0], [0], [1], [0, 0, 1, 1], [], []>} : vector<16x40xf32>, vector<40x256xf32>, vector<16x256xf32> -> vector<16x256xf32>
    %c0_37 = arith.constant 0 : index
    %c0_38 = arith.constant 0 : index
    %c0_39 = arith.constant 0 : index
    %29 = vector.load %arg3[%c0_37, %c0_38, %c0_39] : memref<4x16x1xf32, #tpu.memory_space<vmem>>, vector<1x16x1xf32>
    %30 = vector.shape_cast %29 : vector<1x16x1xf32> to vector<16x1xf32>
    %31 = vector.broadcast %30 : vector<16x1xf32> to vector<16x256xf32>
    %32 = arith.mulf %28, %31 : vector<16x256xf32>
    %c0_40 = arith.constant 0 : index
    %c0_41 = arith.constant 0 : index
    %c0_42 = arith.constant 0 : index
    %33 = vector.load %arg4[%c0_40, %c0_41, %c0_42] : memref<4x16x1xf32, #tpu.memory_space<vmem>>, vector<1x16x1xf32>
    %34 = vector.shape_cast %33 : vector<1x16x1xf32> to vector<16x1xf32>
    %35 = vector.broadcast %34 : vector<16x1xf32> to vector<16x256xf32>
    %36 = arith.addf %32, %35 : vector<16x256xf32>
    %c0_43 = arith.constant 0 : index
    %c128_44 = arith.constant 128 : index
    %37 = vector.load %arg13[%c0_43, %c128_44] : memref<64x512xf32, #tpu.memory_space<vmem>>, vector<16x256xf32>
    tpu.vector_store %arg13[%c0_43, %c128_44], %36 {strides = array<i32>} : memref<64x512xf32, #tpu.memory_space<vmem>>, vector<16x256xf32>,
    %c0_45 = arith.constant 0 : index
    %c124 = arith.constant 124 : index
    %38 = vector.load %arg11[%c0_45, %c124] : memref<8x512xf32, #tpu.memory_space<vmem>>, vector<8x256xf32>
    %c0_46 = arith.constant 0 : index
    %c0_47 = arith.constant 0 : index
    %39 = vector.load %arg12[%c0_46, %c0_47] : memref<40x256xf32, #tpu.memory_space<vmem>>, vector<8x256xf32>
    tpu.vector_store %arg12[%c0_46, %c0_47], %38 {strides = array<i32>} : memref<40x256xf32, #tpu.memory_space<vmem>>, vector<8x256xf32>,
    %c0_48 = arith.constant 0 : index
    %c126_49 = arith.constant 126 : index
    %40 = vector.load %arg11[%c0_48, %c126_49] : memref<8x512xf32, #tpu.memory_space<vmem>>, vector<8x256xf32>
    %c8_50 = arith.constant 8 : index
    %c0_51 = arith.constant 0 : index
    %41 = vector.load %arg12[%c8_50, %c0_51] : memref<40x256xf32, #tpu.memory_space<vmem>>, vector<8x256xf32>
    tpu.vector_store %arg12[%c8_50, %c0_51], %40 {strides = array<i32>} : memref<40x256xf32, #tpu.memory_space<vmem>>, vector<8x256xf32>,
    %c0_52 = arith.constant 0 : index
    %c128_53 = arith.constant 128 : index
    %42 = vector.load %arg11[%c0_52, %c128_53] : memref<8x512xf32, #tpu.memory_space<vmem>>, vector<8x256xf32>
    %c16_54 = arith.constant 16 : index
    %c0_55 = arith.constant 0 : index
    %43 = vector.load %arg12[%c16_54, %c0_55] : memref<40x256xf32, #tpu.memory_space<vmem>>, vector<8x256xf32>
    tpu.vector_store %arg12[%c16_54, %c0_55], %42 {strides = array<i32>} : memref<40x256xf32, #tpu.memory_space<vmem>>, vector<8x256xf32>,
    %c0_56 = arith.constant 0 : index
    %c130_57 = arith.constant 130 : index
    %44 = vector.load %arg11[%c0_56, %c130_57] : memref<8x512xf32, #tpu.memory_space<vmem>>, vector<8x256xf32>
    %c24_58 = arith.constant 24 : index
    %c0_59 = arith.constant 0 : index
    %45 = vector.load %arg12[%c24_58, %c0_59] : memref<40x256xf32, #tpu.memory_space<vmem>>, vector<8x256xf32>
    tpu.vector_store %arg12[%c24_58, %c0_59], %44 {strides = array<i32>} : memref<40x256xf32, #tpu.memory_space<vmem>>, vector<8x256xf32>,
    %c0_60 = arith.constant 0 : index
    %c132 = arith.constant 132 : index
    %46 = vector.load %arg11[%c0_60, %c132] : memref<8x512xf32, #tpu.memory_space<vmem>>, vector<8x256xf32>
    %c32_61 = arith.constant 32 : index
    %c0_62 = arith.constant 0 : index
    %47 = vector.load %arg12[%c32_61, %c0_62] : memref<40x256xf32, #tpu.memory_space<vmem>>, vector<8x256xf32>
    tpu.vector_store %arg12[%c32_61, %c0_62], %46 {strides = array<i32>} : memref<40x256xf32, #tpu.memory_space<vmem>>, vector<8x256xf32>,
    %c1 = arith.constant 1 : index
    %c0_63 = arith.constant 0 : index
    %c0_64 = arith.constant 0 : index
    %48 = vector.load %arg2[%c1, %c0_63, %c0_64] : memref<4x16x40xf32, #tpu.memory_space<vmem>>, vector<1x16x40xf32>
    %49 = vector.shape_cast %48 : vector<1x16x40xf32> to vector<16x40xf32>
    %c0_65 = arith.constant 0 : index
    %c0_66 = arith.constant 0 : index
    %50 = vector.load %arg12[%c0_65, %c0_66] : memref<40x256xf32, #tpu.memory_space<vmem>>, vector<40x256xf32>
    %cst_67 = arith.constant dense<0.000000e+00> : vector<16x256xf32>
    %51 = tpu.matmul %49, %50, %cst_67 {dimension_numbers = #tpu.dot_dimension_numbers<[1], [0], [0], [1], [0, 0, 1, 1], [], []>} : vector<16x40xf32>, vector<40x256xf32>, vector<16x256xf32> -> vector<16x256xf32>
    %c1_68 = arith.constant 1 : index
    %c0_69 = arith.constant 0 : index
    %c0_70 = arith.constant 0 : index
    %52 = vector.load %arg3[%c1_68, %c0_69, %c0_70] : memref<4x16x1xf32, #tpu.memory_space<vmem>>, vector<1x16x1xf32>
    %53 = vector.shape_cast %52 : vector<1x16x1xf32> to vector<16x1xf32>
    %54 = vector.broadcast %53 : vector<16x1xf32> to vector<16x256xf32>
    %55 = arith.mulf %51, %54 : vector<16x256xf32>
    %c1_71 = arith.constant 1 : index
    %c0_72 = arith.constant 0 : index
    %c0_73 = arith.constant 0 : index
    %56 = vector.load %arg4[%c1_71, %c0_72, %c0_73] : memref<4x16x1xf32, #tpu.memory_space<vmem>>, vector<1x16x1xf32>
    %57 = vector.shape_cast %56 : vector<1x16x1xf32> to vector<16x1xf32>
    %58 = vector.broadcast %57 : vector<16x1xf32> to vector<16x256xf32>
    %59 = arith.addf %55, %58 : vector<16x256xf32>
    %c16_74 = arith.constant 16 : index
    %c128_75 = arith.constant 128 : index
    %60 = vector.load %arg13[%c16_74, %c128_75] : memref<64x512xf32, #tpu.memory_space<vmem>>, vector<16x256xf32>
    tpu.vector_store %arg13[%c16_74, %c128_75], %59 {strides = array<i32>} : memref<64x512xf32, #tpu.memory_space<vmem>>, vector<16x256xf32>,
    %c0_76 = arith.constant 0 : index
    %c122 = arith.constant 122 : index
    %61 = vector.load %arg11[%c0_76, %c122] : memref<8x512xf32, #tpu.memory_space<vmem>>, vector<8x256xf32>
    %c0_77 = arith.constant 0 : index
    %c0_78 = arith.constant 0 : index
    %62 = vector.load %arg12[%c0_77, %c0_78] : memref<40x256xf32, #tpu.memory_space<vmem>>, vector<8x256xf32>
    tpu.vector_store %arg12[%c0_77, %c0_78], %61 {strides = array<i32>} : memref<40x256xf32, #tpu.memory_space<vmem>>, vector<8x256xf32>,
    %c0_79 = arith.constant 0 : index
    %c125 = arith.constant 125 : index
    %63 = vector.load %arg11[%c0_79, %c125] : memref<8x512xf32, #tpu.memory_space<vmem>>, vector<8x256xf32>
    %c8_80 = arith.constant 8 : index
    %c0_81 = arith.constant 0 : index
    %64 = vector.load %arg12[%c8_80, %c0_81] : memref<40x256xf32, #tpu.memory_space<vmem>>, vector<8x256xf32>
    tpu.vector_store %arg12[%c8_80, %c0_81], %63 {strides = array<i32>} : memref<40x256xf32, #tpu.memory_space<vmem>>, vector<8x256xf32>,
    %c0_82 = arith.constant 0 : index
    %c128_83 = arith.constant 128 : index
    %65 = vector.load %arg11[%c0_82, %c128_83] : memref<8x512xf32, #tpu.memory_space<vmem>>, vector<8x256xf32>
    %c16_84 = arith.constant 16 : index
    %c0_85 = arith.constant 0 : index
    %66 = vector.load %arg12[%c16_84, %c0_85] : memref<40x256xf32, #tpu.memory_space<vmem>>, vector<8x256xf32>
    tpu.vector_store %arg12[%c16_84, %c0_85], %65 {strides = array<i32>} : memref<40x256xf32, #tpu.memory_space<vmem>>, vector<8x256xf32>,
    %c0_86 = arith.constant 0 : index
    %c131 = arith.constant 131 : index
    %67 = vector.load %arg11[%c0_86, %c131] : memref<8x512xf32, #tpu.memory_space<vmem>>, vector<8x256xf32>
    %c24_87 = arith.constant 24 : index
    %c0_88 = arith.constant 0 : index
    %68 = vector.load %arg12[%c24_87, %c0_88] : memref<40x256xf32, #tpu.memory_space<vmem>>, vector<8x256xf32>
    tpu.vector_store %arg12[%c24_87, %c0_88], %67 {strides = array<i32>} : memref<40x256xf32, #tpu.memory_space<vmem>>, vector<8x256xf32>,
    %c0_89 = arith.constant 0 : index
    %c134 = arith.constant 134 : index
    %69 = vector.load %arg11[%c0_89, %c134] : memref<8x512xf32, #tpu.memory_space<vmem>>, vector<8x256xf32>
    %c32_90 = arith.constant 32 : index
    %c0_91 = arith.constant 0 : index
    %70 = vector.load %arg12[%c32_90, %c0_91] : memref<40x256xf32, #tpu.memory_space<vmem>>, vector<8x256xf32>
    tpu.vector_store %arg12[%c32_90, %c0_91], %69 {strides = array<i32>} : memref<40x256xf32, #tpu.memory_space<vmem>>, vector<8x256xf32>,
    %c2 = arith.constant 2 : index
    %c0_92 = arith.constant 0 : index
    %c0_93 = arith.constant 0 : index
    %71 = vector.load %arg2[%c2, %c0_92, %c0_93] : memref<4x16x40xf32, #tpu.memory_space<vmem>>, vector<1x16x40xf32>
    %72 = vector.shape_cast %71 : vector<1x16x40xf32> to vector<16x40xf32>
    %c0_94 = arith.constant 0 : index
    %c0_95 = arith.constant 0 : index
    %73 = vector.load %arg12[%c0_94, %c0_95] : memref<40x256xf32, #tpu.memory_space<vmem>>, vector<40x256xf32>
    %cst_96 = arith.constant dense<0.000000e+00> : vector<16x256xf32>
    %74 = tpu.matmul %72, %73, %cst_96 {dimension_numbers = #tpu.dot_dimension_numbers<[1], [0], [0], [1], [0, 0, 1, 1], [], []>} : vector<16x40xf32>, vector<40x256xf32>, vector<16x256xf32> -> vector<16x256xf32>
    %c2_97 = arith.constant 2 : index
    %c0_98 = arith.constant 0 : index
    %c0_99 = arith.constant 0 : index
    %75 = vector.load %arg3[%c2_97, %c0_98, %c0_99] : memref<4x16x1xf32, #tpu.memory_space<vmem>>, vector<1x16x1xf32>
    %76 = vector.shape_cast %75 : vector<1x16x1xf32> to vector<16x1xf32>
    %77 = vector.broadcast %76 : vector<16x1xf32> to vector<16x256xf32>
    %78 = arith.mulf %74, %77 : vector<16x256xf32>
    %c2_100 = arith.constant 2 : index
    %c0_101 = arith.constant 0 : index
    %c0_102 = arith.constant 0 : index
    %79 = vector.load %arg4[%c2_100, %c0_101, %c0_102] : memref<4x16x1xf32, #tpu.memory_space<vmem>>, vector<1x16x1xf32>
    %80 = vector.shape_cast %79 : vector<1x16x1xf32> to vector<16x1xf32>
    %81 = vector.broadcast %80 : vector<16x1xf32> to vector<16x256xf32>
    %82 = arith.addf %78, %81 : vector<16x256xf32>
    %c32_103 = arith.constant 32 : index
    %c128_104 = arith.constant 128 : index
    %83 = vector.load %arg13[%c32_103, %c128_104] : memref<64x512xf32, #tpu.memory_space<vmem>>, vector<16x256xf32>
    tpu.vector_store %arg13[%c32_103, %c128_104], %82 {strides = array<i32>} : memref<64x512xf32, #tpu.memory_space<vmem>>, vector<16x256xf32>,
    %c0_105 = arith.constant 0 : index
    %c120 = arith.constant 120 : index
    %84 = vector.load %arg11[%c0_105, %c120] : memref<8x512xf32, #tpu.memory_space<vmem>>, vector<8x256xf32>
    %c0_106 = arith.constant 0 : index
    %c0_107 = arith.constant 0 : index
    %85 = vector.load %arg12[%c0_106, %c0_107] : memref<40x256xf32, #tpu.memory_space<vmem>>, vector<8x256xf32>
    tpu.vector_store %arg12[%c0_106, %c0_107], %84 {strides = array<i32>} : memref<40x256xf32, #tpu.memory_space<vmem>>, vector<8x256xf32>,
    %c0_108 = arith.constant 0 : index
    %c124_109 = arith.constant 124 : index
    %86 = vector.load %arg11[%c0_108, %c124_109] : memref<8x512xf32, #tpu.memory_space<vmem>>, vector<8x256xf32>
    %c8_110 = arith.constant 8 : index
    %c0_111 = arith.constant 0 : index
    %87 = vector.load %arg12[%c8_110, %c0_111] : memref<40x256xf32, #tpu.memory_space<vmem>>, vector<8x256xf32>
    tpu.vector_store %arg12[%c8_110, %c0_111], %86 {strides = array<i32>} : memref<40x256xf32, #tpu.memory_space<vmem>>, vector<8x256xf32>,
    %c0_112 = arith.constant 0 : index
    %c128_113 = arith.constant 128 : index
    %88 = vector.load %arg11[%c0_112, %c128_113] : memref<8x512xf32, #tpu.memory_space<vmem>>, vector<8x256xf32>
    %c16_114 = arith.constant 16 : index
    %c0_115 = arith.constant 0 : index
    %89 = vector.load %arg12[%c16_114, %c0_115] : memref<40x256xf32, #tpu.memory_space<vmem>>, vector<8x256xf32>
    tpu.vector_store %arg12[%c16_114, %c0_115], %88 {strides = array<i32>} : memref<40x256xf32, #tpu.memory_space<vmem>>, vector<8x256xf32>,
    %c0_116 = arith.constant 0 : index
    %c132_117 = arith.constant 132 : index
    %90 = vector.load %arg11[%c0_116, %c132_117] : memref<8x512xf32, #tpu.memory_space<vmem>>, vector<8x256xf32>
    %c24_118 = arith.constant 24 : index
    %c0_119 = arith.constant 0 : index
    %91 = vector.load %arg12[%c24_118, %c0_119] : memref<40x256xf32, #tpu.memory_space<vmem>>, vector<8x256xf32>
    tpu.vector_store %arg12[%c24_118, %c0_119], %90 {strides = array<i32>} : memref<40x256xf32, #tpu.memory_space<vmem>>, vector<8x256xf32>,
    %c0_120 = arith.constant 0 : index
    %c136 = arith.constant 136 : index
    %92 = vector.load %arg11[%c0_120, %c136] : memref<8x512xf32, #tpu.memory_space<vmem>>, vector<8x256xf32>
    %c32_121 = arith.constant 32 : index
    %c0_122 = arith.constant 0 : index
    %93 = vector.load %arg12[%c32_121, %c0_122] : memref<40x256xf32, #tpu.memory_space<vmem>>, vector<8x256xf32>
    tpu.vector_store %arg12[%c32_121, %c0_122], %92 {strides = array<i32>} : memref<40x256xf32, #tpu.memory_space<vmem>>, vector<8x256xf32>,
    %c3 = arith.constant 3 : index
    %c0_123 = arith.constant 0 : index
    %c0_124 = arith.constant 0 : index
    %94 = vector.load %arg2[%c3, %c0_123, %c0_124] : memref<4x16x40xf32, #tpu.memory_space<vmem>>, vector<1x16x40xf32>
    %95 = vector.shape_cast %94 : vector<1x16x40xf32> to vector<16x40xf32>
    %c0_125 = arith.constant 0 : index
    %c0_126 = arith.constant 0 : index
    %96 = vector.load %arg12[%c0_125, %c0_126] : memref<40x256xf32, #tpu.memory_space<vmem>>, vector<40x256xf32>
    %cst_127 = arith.constant dense<0.000000e+00> : vector<16x256xf32>
    %97 = tpu.matmul %95, %96, %cst_127 {dimension_numbers = #tpu.dot_dimension_numbers<[1], [0], [0], [1], [0, 0, 1, 1], [], []>} : vector<16x40xf32>, vector<40x256xf32>, vector<16x256xf32> -> vector<16x256xf32>
    %c3_128 = arith.constant 3 : index
    %c0_129 = arith.constant 0 : index
    %c0_130 = arith.constant 0 : index
    %98 = vector.load %arg3[%c3_128, %c0_129, %c0_130] : memref<4x16x1xf32, #tpu.memory_space<vmem>>, vector<1x16x1xf32>
    %99 = vector.shape_cast %98 : vector<1x16x1xf32> to vector<16x1xf32>
    %100 = vector.broadcast %99 : vector<16x1xf32> to vector<16x256xf32>
    %101 = arith.mulf %97, %100 : vector<16x256xf32>
    %c3_131 = arith.constant 3 : index
    %c0_132 = arith.constant 0 : index
    %c0_133 = arith.constant 0 : index
    %102 = vector.load %arg4[%c3_131, %c0_132, %c0_133] : memref<4x16x1xf32, #tpu.memory_space<vmem>>, vector<1x16x1xf32>
    %103 = vector.shape_cast %102 : vector<1x16x1xf32> to vector<16x1xf32>
    %104 = vector.broadcast %103 : vector<16x1xf32> to vector<16x256xf32>
    %105 = arith.addf %101, %104 : vector<16x256xf32>
    %c48 = arith.constant 48 : index
    %c128_134 = arith.constant 128 : index
    %106 = vector.load %arg13[%c48, %c128_134] : memref<64x512xf32, #tpu.memory_space<vmem>>, vector<16x256xf32>
    tpu.vector_store %arg13[%c48, %c128_134], %105 {strides = array<i32>} : memref<64x512xf32, #tpu.memory_space<vmem>>, vector<16x256xf32>,
    %c0_135 = arith.constant 0 : index
    %c126_136 = arith.constant 126 : index
    %107 = vector.load %arg13[%c0_135, %c126_136] : memref<64x512xf32, #tpu.memory_space<vmem>>, vector<64x256xf32>
    %c0_137 = arith.constant 0 : index
    %c0_138 = arith.constant 0 : index
    %108 = vector.load %arg14[%c0_137, %c0_138] : memref<320x256xf32, #tpu.memory_space<vmem>>, vector<64x256xf32>
    tpu.vector_store %arg14[%c0_137, %c0_138], %107 {strides = array<i32>} : memref<320x256xf32, #tpu.memory_space<vmem>>, vector<64x256xf32>,
    %c0_139 = arith.constant 0 : index
    %c127_140 = arith.constant 127 : index
    %109 = vector.load %arg13[%c0_139, %c127_140] : memref<64x512xf32, #tpu.memory_space<vmem>>, vector<64x256xf32>
    %c64 = arith.constant 64 : index
    %c0_141 = arith.constant 0 : index
    %110 = vector.load %arg14[%c64, %c0_141] : memref<320x256xf32, #tpu.memory_space<vmem>>, vector<64x256xf32>
    tpu.vector_store %arg14[%c64, %c0_141], %109 {strides = array<i32>} : memref<320x256xf32, #tpu.memory_space<vmem>>, vector<64x256xf32>,
    %c0_142 = arith.constant 0 : index
    %c128_143 = arith.constant 128 : index
    %111 = vector.load %arg13[%c0_142, %c128_143] : memref<64x512xf32, #tpu.memory_space<vmem>>, vector<64x256xf32>
    %c128_144 = arith.constant 128 : index
    %c0_145 = arith.constant 0 : index
    %112 = vector.load %arg14[%c128_144, %c0_145] : memref<320x256xf32, #tpu.memory_space<vmem>>, vector<64x256xf32>
    tpu.vector_store %arg14[%c128_144, %c0_145], %111 {strides = array<i32>} : memref<320x256xf32, #tpu.memory_space<vmem>>, vector<64x256xf32>,
    %c0_146 = arith.constant 0 : index
    %c129_147 = arith.constant 129 : index
    %113 = vector.load %arg13[%c0_146, %c129_147] : memref<64x512xf32, #tpu.memory_space<vmem>>, vector<64x256xf32>
    %c192 = arith.constant 192 : index
    %c0_148 = arith.constant 0 : index
    %114 = vector.load %arg14[%c192, %c0_148] : memref<320x256xf32, #tpu.memory_space<vmem>>, vector<64x256xf32>
    tpu.vector_store %arg14[%c192, %c0_148], %113 {strides = array<i32>} : memref<320x256xf32, #tpu.memory_space<vmem>>, vector<64x256xf32>,
    %c0_149 = arith.constant 0 : index
    %c130_150 = arith.constant 130 : index
    %115 = vector.load %arg13[%c0_149, %c130_150] : memref<64x512xf32, #tpu.memory_space<vmem>>, vector<64x256xf32>
    %c256 = arith.constant 256 : index
    %c0_151 = arith.constant 0 : index
    %116 = vector.load %arg14[%c256, %c0_151] : memref<320x256xf32, #tpu.memory_space<vmem>>, vector<64x256xf32>
    tpu.vector_store %arg14[%c256, %c0_151], %115 {strides = array<i32>} : memref<320x256xf32, #tpu.memory_space<vmem>>, vector<64x256xf32>,
    %c0_152 = arith.constant 0 : index
    %c0_153 = arith.constant 0 : index
    %117 = vector.load %arg5[%c0_152, %c0_153] : memref<32x320xf32, #tpu.memory_space<vmem>>, vector<32x320xf32>
    %c0_154 = arith.constant 0 : index
    %c0_155 = arith.constant 0 : index
    %118 = vector.load %arg14[%c0_154, %c0_155] : memref<320x256xf32, #tpu.memory_space<vmem>>, vector<320x256xf32>
    %cst_156 = arith.constant dense<0.000000e+00> : vector<32x256xf32>
    %119 = tpu.matmul %117, %118, %cst_156 {dimension_numbers = #tpu.dot_dimension_numbers<[1], [0], [0], [1], [0, 0, 1, 1], [], []>} : vector<32x320xf32>, vector<320x256xf32>, vector<32x256xf32> -> vector<32x256xf32>
    %c0_157 = arith.constant 0 : index
    %c0_158 = arith.constant 0 : index
    %120 = vector.load %arg6[%c0_157, %c0_158] : memref<32x1xf32, #tpu.memory_space<vmem>>, vector<32x1xf32>
    %121 = vector.broadcast %120 : vector<32x1xf32> to vector<32x256xf32>
    %122 = arith.addf %119, %121 : vector<32x256xf32>
    %c0_159 = arith.constant 0 : index
    %c128_160 = arith.constant 128 : index
    %123 = vector.load %arg15[%c0_159, %c128_160] : memref<32x512xf32, #tpu.memory_space<vmem>>, vector<32x256xf32>
    tpu.vector_store %arg15[%c0_159, %c128_160], %122 {strides = array<i32>} : memref<32x512xf32, #tpu.memory_space<vmem>>, vector<32x256xf32>,
    %c0_161 = arith.constant 0 : index
    %c126_162 = arith.constant 126 : index
    %124 = vector.load %arg15[%c0_161, %c126_162] : memref<32x512xf32, #tpu.memory_space<vmem>>, vector<32x256xf32>
    %c0_163 = arith.constant 0 : index
    %c0_164 = arith.constant 0 : index
    %125 = vector.load %arg16[%c0_163, %c0_164] : memref<160x256xf32, #tpu.memory_space<vmem>>, vector<32x256xf32>
    tpu.vector_store %arg16[%c0_163, %c0_164], %124 {strides = array<i32>} : memref<160x256xf32, #tpu.memory_space<vmem>>, vector<32x256xf32>,
    %c0_165 = arith.constant 0 : index
    %c127_166 = arith.constant 127 : index
    %126 = vector.load %arg15[%c0_165, %c127_166] : memref<32x512xf32, #tpu.memory_space<vmem>>, vector<32x256xf32>
    %c32_167 = arith.constant 32 : index
    %c0_168 = arith.constant 0 : index
    %127 = vector.load %arg16[%c32_167, %c0_168] : memref<160x256xf32, #tpu.memory_space<vmem>>, vector<32x256xf32>
    tpu.vector_store %arg16[%c32_167, %c0_168], %126 {strides = array<i32>} : memref<160x256xf32, #tpu.memory_space<vmem>>, vector<32x256xf32>,
    %c0_169 = arith.constant 0 : index
    %c128_170 = arith.constant 128 : index
    %128 = vector.load %arg15[%c0_169, %c128_170] : memref<32x512xf32, #tpu.memory_space<vmem>>, vector<32x256xf32>
    %c64_171 = arith.constant 64 : index
    %c0_172 = arith.constant 0 : index
    %129 = vector.load %arg16[%c64_171, %c0_172] : memref<160x256xf32, #tpu.memory_space<vmem>>, vector<32x256xf32>
    tpu.vector_store %arg16[%c64_171, %c0_172], %128 {strides = array<i32>} : memref<160x256xf32, #tpu.memory_space<vmem>>, vector<32x256xf32>,
    %c0_173 = arith.constant 0 : index
    %c129_174 = arith.constant 129 : index
    %130 = vector.load %arg15[%c0_173, %c129_174] : memref<32x512xf32, #tpu.memory_space<vmem>>, vector<32x256xf32>
    %c96 = arith.constant 96 : index
    %c0_175 = arith.constant 0 : index
    %131 = vector.load %arg16[%c96, %c0_175] : memref<160x256xf32, #tpu.memory_space<vmem>>, vector<32x256xf32>
    tpu.vector_store %arg16[%c96, %c0_175], %130 {strides = array<i32>} : memref<160x256xf32, #tpu.memory_space<vmem>>, vector<32x256xf32>,
    %c0_176 = arith.constant 0 : index
    %c130_177 = arith.constant 130 : index
    %132 = vector.load %arg15[%c0_176, %c130_177] : memref<32x512xf32, #tpu.memory_space<vmem>>, vector<32x256xf32>
    %c128_178 = arith.constant 128 : index
    %c0_179 = arith.constant 0 : index
    %133 = vector.load %arg16[%c128_178, %c0_179] : memref<160x256xf32, #tpu.memory_space<vmem>>, vector<32x256xf32>
    tpu.vector_store %arg16[%c128_178, %c0_179], %132 {strides = array<i32>} : memref<160x256xf32, #tpu.memory_space<vmem>>, vector<32x256xf32>,
    %c0_180 = arith.constant 0 : index
    %c0_181 = arith.constant 0 : index
    %134 = vector.load %arg7[%c0_180, %c0_181] : memref<16x160xf32, #tpu.memory_space<vmem>>, vector<16x160xf32>
    %c0_182 = arith.constant 0 : index
    %c0_183 = arith.constant 0 : index
    %135 = vector.load %arg16[%c0_182, %c0_183] : memref<160x256xf32, #tpu.memory_space<vmem>>, vector<160x256xf32>
    %cst_184 = arith.constant dense<0.000000e+00> : vector<16x256xf32>
    %136 = tpu.matmul %134, %135, %cst_184 {dimension_numbers = #tpu.dot_dimension_numbers<[1], [0], [0], [1], [0, 0, 1, 1], [], []>} : vector<16x160xf32>, vector<160x256xf32>, vector<16x256xf32> -> vector<16x256xf32>
    %c0_185 = arith.constant 0 : index
    %c0_186 = arith.constant 0 : index
    %137 = vector.load %arg8[%c0_185, %c0_186] : memref<16x1xf32, #tpu.memory_space<vmem>>, vector<16x1xf32>
    %138 = vector.broadcast %137 : vector<16x1xf32> to vector<16x256xf32>
    %139 = arith.mulf %136, %138 : vector<16x256xf32>
    %c0_187 = arith.constant 0 : index
    %c0_188 = arith.constant 0 : index
    %140 = vector.load %arg9[%c0_187, %c0_188] : memref<16x1xf32, #tpu.memory_space<vmem>>, vector<16x1xf32>
    %141 = vector.broadcast %140 : vector<16x1xf32> to vector<16x256xf32>
    %142 = arith.addf %139, %141 : vector<16x256xf32>
    %c0_189 = arith.constant 0 : index
    %c0_190 = arith.constant 0 : index
    %c0_191 = arith.constant 0 : index
    %143 = vector.load %arg10[%c0_189, %c0_190, %c0_191] : memref<1x16x256xf32, #tpu.memory_space<vmem>>, vector<1x16x256xf32>
    %144 = vector.shape_cast %143 : vector<1x16x256xf32> to vector<16x256xf32>
    %145 = vector.shape_cast %142 : vector<16x256xf32> to vector<1x16x256xf32>
    tpu.vector_store %arg10[%c0_189, %c0_190, %c0_191], %145 {strides = array<i32>} : memref<1x16x256xf32, #tpu.memory_space<vmem>>, vector<1x16x256xf32>,
    return
  }
  func.func @transform_0(%arg0: i32) -> (i32, i32, i32) {
    %c0_i32 = arith.constant 0 : i32
    %c0_i32_0 = arith.constant 0 : i32
    %c0_i32_1 = arith.constant 0 : i32
    return %arg0, %c0_i32, %c0_i32_0 : i32, i32, i32
  }
  func.func @transform_1(%arg0: i32) -> (i32, i32, i32) {
    %c0_i32 = arith.constant 0 : i32
    %c0_i32_0 = arith.constant 0 : i32
    %c0_i32_1 = arith.constant 0 : i32
    %c0_i32_2 = arith.constant 0 : i32
    return %c0_i32, %c0_i32_0, %c0_i32_1 : i32, i32, i32
  }
  func.func @transform_2(%arg0: i32) -> (i32, i32, i32) {
    %c0_i32 = arith.constant 0 : i32
    %c0_i32_0 = arith.constant 0 : i32
    %c0_i32_1 = arith.constant 0 : i32
    %c0_i32_2 = arith.constant 0 : i32
    return %c0_i32, %c0_i32_0, %c0_i32_1 : i32, i32, i32
  }
  func.func @transform_3(%arg0: i32) -> (i32, i32, i32) {
    %c0_i32 = arith.constant 0 : i32
    %c0_i32_0 = arith.constant 0 : i32
    %c0_i32_1 = arith.constant 0 : i32
    %c0_i32_2 = arith.constant 0 : i32
    return %c0_i32, %c0_i32_0, %c0_i32_1 : i32, i32, i32
  }
  func.func @transform_4(%arg0: i32) -> (i32, i32) {
    %c0_i32 = arith.constant 0 : i32
    %c0_i32_0 = arith.constant 0 : i32
    %c0_i32_1 = arith.constant 0 : i32
    return %c0_i32, %c0_i32_0 : i32, i32
  }
  func.func @transform_5(%arg0: i32) -> (i32, i32) {
    %c0_i32 = arith.constant 0 : i32
    %c0_i32_0 = arith.constant 0 : i32
    %c0_i32_1 = arith.constant 0 : i32
    return %c0_i32, %c0_i32_0 : i32, i32
  }
  func.func @transform_6(%arg0: i32) -> (i32, i32) {
    %c0_i32 = arith.constant 0 : i32
    %c0_i32_0 = arith.constant 0 : i32
    %c0_i32_1 = arith.constant 0 : i32
    return %c0_i32, %c0_i32_0 : i32, i32
  }
  func.func @transform_7(%arg0: i32) -> (i32, i32) {
    %c0_i32 = arith.constant 0 : i32
    %c0_i32_0 = arith.constant 0 : i32
    %c0_i32_1 = arith.constant 0 : i32
    return %c0_i32, %c0_i32_0 : i32, i32
  }
  func.func @transform_8(%arg0: i32) -> (i32, i32) {
    %c0_i32 = arith.constant 0 : i32
    %c0_i32_0 = arith.constant 0 : i32
    %c0_i32_1 = arith.constant 0 : i32
    return %c0_i32, %c0_i32_0 : i32, i32
  }
  func.func @transform_9(%arg0: i32) -> (i32, i32, i32) {
    %c0_i32 = arith.constant 0 : i32
    %c0_i32_0 = arith.constant 0 : i32
    %c0_i32_1 = arith.constant 0 : i32
    return %arg0, %c0_i32, %c0_i32_0 : i32, i32, i32
  }
}

</mosaic_0001>

<bundles_post_ra>
// kernel: create_mse_forward.1
= control target key start
LH: loop header
LB: loop body
LE: loop exit
PB: predicated region body
PF: predicated region fallthrough
CT: control target
= control target key end

     0   :  { %s3162_s30 = smov 0   ;;  %s4130_s0 = inlined_call_operand.vmem [shape: f32[2,8,256], index: 0, kind: input, shape index: {}]   ;;  %s4131_s1 = inlined_call_operand.vmem [shape: f32[4,16,40], index: 1, kind: input, shape index: {}]   ;;  %s4132_s2 = inlined_call_operand.vmem [shape: f32[4,16,1], index: 2, kind: input, shape index: {}]   ;;  %s4133_s3 = inlined_call_operand.vmem [shape: f32[4,16,1], index: 3, kind: input, shape index: {}]   ;;  %s4134_s4 = inlined_call_operand.vmem [shape: f32[32,320], index: 4, kind: input, shape index: {}]   ;;  %s4135_s5 = inlined_call_operand.vmem [shape: f32[32,1], index: 5, kind: input, shape index: {}]   ;;  %s4136_s6 = inlined_call_operand.vmem [shape: f32[16,160], index: 6, kind: input, shape index: {}]   ;;  %s4137_s7 = inlined_call_operand.vmem [shape: f32[16,1], index: 7, kind: input, shape index: {}]   ;;  %s4138_s8 = inlined_call_operand.vmem [shape: f32[16,1], index: 8, kind: input, shape index: {}]   ;;  %s4139_s9 = inlined_call_operand.vmem [shape: f32[2,16,256], index: 9, kind: output, shape index: {}]  }
   0x1 LB: > { %s2546_s10 = sadd.s32 4294967295, %s3096_s30   ;;  %p2550_p0 = scmp.ge.s32.totalorder %s3096_s30, 1  ;;  %s3096_s30 = sphi %s3162_s30, %s19_s30  }
   0x2   : > { %p287_p1 = scmp.lt.s32.totalorder %s3096_s30, 3 }
   0x4   : > { %p288_p2 = pnand %p2550_p0, %p287_p1 }
   0x5   : > { %p323_p3 = scmp.lt.s32.totalorder (!%p288_p2), %s2546_s10, 1  ;;  %s3099_s15 = smov (!%p288_p2), 1  }
   0x6   : > { %291 = sbr.rel (%p288_p2) target bundleno = 1034 (0x40a), region = 56  ;;  %s3100_s16 = smov (!%p288_p2), 2  }
   0x7   : > { %s3101_s17 = smov (!%p288_p2), 127   ;;  %s3102_s18 = smov (!%p288_p2), 124  }
   0x8   : > { %s3103_s19 = smov (!%p288_p2), 126   ;;  %s3104_s20 = smov (!%p288_p2), 4  }
   0x9   : > { %s3105_s21 = smov (!%p288_p2), 120   ;;  %s3106_s22 = smov (!%p288_p2), 8  }
   0xa   : > { %s3107_s23 = smov (!%p288_p2), 122   ;;  %s3108_s24 = smov (!%p288_p2), 125  }
   0xb   : > { %s4168_s10 = smov (!%p323_p3, %s2546_s10), 1  ;;  %v4140_v2 = vmov 0.0   ;;  %s3109_s25 = smov 3   ;;  %v3111_v8 = vmov 0   ;;  %v508_v9 = vld [vmem:[%s4132_s2] sm:$0xff]  ;;  %v525_v11 = vld [vmem:[%s4133_s3 + $0x8] sm:$0xff] }
   0xc   : > { %s2603_s11 = sshll.u32 %s4168_s10, 4  ;;  %s3110_s26 = smov 6   ;;  %2732 = vset.pattern.permute.xlu1 %v3111_v8  ;;  %2733 = vset.pattern.permute.xlu2 %v3111_v8  ;;  %v509_v12 = vld [vmem:[%s4132_s2 + $0x8] sm:$0xff]  ;;  %v2566_v14 = vld [vmem:[%s4132_s2 + $0x18] sm:$0xff]  ;;  %v2565_v15 = vld [vmem:[%s4132_s2 + $0x10] sm:$0xff]  ;;  %vm436_vm0 = vcmask 1031168  }
   0xd   : > { %s327_s14 = scalar_lea.vmem %s4130_s0, %s2603_s11  ;;  %2734 = vset.pattern.permute.xlu0 %v3111_v8  ;;  %v2575_v18 = vld [vmem:[%s4132_s2 + $0x20] sm:$0xff]  ;;  %v2567_v19 = vld [vmem:[%s4133_s3 + $0x10] sm:$0xff]  ;;  %v2588_v23 = vld [vmem:[%s4133_s3 + $0x38] sm:$0xff]  ;;  %vm615_vm1 = vcmask 1014784   ;;  %vm417_vm2 = vcmask 1039360   ;;  %vm394_vm3 = vcmask 7168  }
   0xe   : > { %v3176_v0 = vld [vmem:[%s327_s14] sm:$0xff]  ;;  %v3178_v1 = vld [vmem:[%s327_s14 + $0x8] sm:$0xff]  ;;  %v2586_v24 = vld [vmem:[%s4132_s2 + $0x38] sm:$0xff]  ;;  %vm375_vm4 = vcmask 15360   ;;  %vm556_vm5 = vcmask 31744   ;;  %vm455_vm6 = vcmask 326656  }
   0xf   : > { %v2637_v3 = vpack.i.bf16 %v3176_v0, %v4140_v2  ;;  %v2647_v4 = vpack.i.bf16 %v3178_v1, %v3176_v0  ;;  %v2642_v5 = vpack.i.bf16 0.0, %v3178_v1  ;;  %v2652_v6 = vpack.i.bf16 %v3176_v0, %v3176_v0  ;;  %v524_v25 = vld [vmem:[%s4133_s3] sm:$0xff]  ;;  %v2578_v38 = vld [vmem:[%s4133_s3 + $0x28] sm:$0xff]  ;;  %v2568_v45 = vld [vmem:[%s4133_s3 + $0x18] sm:$0xff]  ;;  %s2604_s29 = sshll.u32 %s4168_s10, 5 }
  0x10   : > { %v2662_v7 = vpack.i.bf16 %v3178_v1, %v3178_v1  ;;  %v2576_v42 = vld [vmem:[%s4132_s2 + $0x28] sm:$0xff]  ;;  %v443_v60 = vld [vmem:[%s4131_s1] sm:$0xff]  ;;  %vm979_vm7 = vcmask 982016   ;;  %vm920_vm8 = vcmask 64512   ;;  %vm798_vm9 = vcmask 998400  }
  0x11   : > { %2638 = vrot.lane.b32.xlu1 %v2637_v3, %s3099_s15  ;;  %2628 = vrot.lane.b32.xlu0 %v2637_v3, %s3100_s16  ;;  %vm779_vm10 = vcmask 1022976   ;;  %vm756_vm11 = vcmask 23552   ;;  %vm737_vm12 = vcmask 48128   ;;  %vm1813_vm13 = vcmask 523264  }
  0x12   : > { %2648 = vrot.lane.b32.xlu2 %v2647_v4, %s3101_s17  ;;  %vm2356_vm14 = vcmask 261120  }
  0x19   : > { %2643 = vrot.lane.b32.xlu1 %v2642_v5, %s3099_s15  ;;  %2633 = vrot.lane.b32.xlu0 %v2642_v5, %s3100_s16 }
  0x1a   : > { %415 = vrot.lane.b32.xlu2 %v4140_v2, %s3101_s17 }
  0x21   : > { %2658 = vrot.lane.b32.xlu1 %v2647_v4, %s3102_s18  ;;  %2653 = vrot.lane.b32.xlu0 %v2652_v6, %s3103_s19 }
  0x22   : > { %2663 = vrot.lane.b32.xlu2 %v2662_v7, %s3103_s19 }
  0x29   : > { %2673 = vrot.lane.b32.xlu1 %v2637_v3, %s3104_s20  ;;  %2668 = vrot.lane.b32.xlu0 %v2647_v4, %s3100_s16 }
  0x2a   : > { %2678 = vrot.lane.b32.xlu2 %v2637_v3, %s3102_s18 }
  0x31   : > { %2688 = vrot.lane.b32.xlu1 %v2642_v5, %s3104_s20  ;;  %2683 = vrot.lane.b32.xlu0 %v4140_v2, %s3103_s19 }
  0x32   : > { %2693 = vrot.lane.b32.xlu2 %v2647_v4, %s3105_s21 }
  0x39   : > { %2703 = vrot.lane.b32.xlu1 %v2647_v4, %s3104_s20  ;;  %2698 = vrot.lane.b32.xlu0 %v2642_v5, %s3102_s18  ;;  %v2585_v5 = vld [vmem:[%s4132_s2 + $0x30] sm:$0xff] }
  0x3a   : > { %2708 = vrot.lane.b32.xlu2 %v2637_v3, %s3106_s22 }
  0x41   : > { %2713 = vrot.lane.b32.xlu1 %v2647_v4, %s3107_s23  ;;  %977 = vrot.lane.b32.xlu0 %v4140_v2, %s3105_s21 }
  0x42   : > { %2718 = vrot.lane.b32.xlu2 %v2647_v4, %s3108_s24  ;;  %v2559_v4 = vld [vmem:[%s4131_s1 + $0x10] sm:$0xff] }
  0x49   : > { %918 = vrot.lane.b32.xlu1 %v3178_v1, %s3106_s22  ;;  %2723 = vrot.lane.b32.xlu0 %v2637_v3, %s3109_s25 }
  0x4a   : > { %2728 = vrot.lane.b32.xlu2 %v2637_v3, %s3110_s26  ;;  %v2577_v3 = vld [vmem:[%s4133_s3 + $0x20] sm:$0xff] }
  0x51   : > { %777 = vrot.lane.b32.xlu1 %v4140_v2, %s3108_s24  ;;  %796 = vrot.lane.b32.xlu0 %v4140_v2, %s3107_s23 }
  0x52   : > { %754 = vrot.lane.b32.xlu2 %v3178_v1, %s3109_s25 }
  0x59   : > { %735 = vrot.lane.b32.xlu0 %v3178_v1, %s3110_s26  ;;  %512 = vperm.xlu1 %2732, %v508_v9  }
  0x5a   : > { %517 = vperm.xlu2 %2733, %v509_v12  }
  0x61   : > { %533 = vperm.xlu1 %2732, %v525_v11   ;;  %528 = vperm.xlu0 %2734, %v524_v25  }
  0x62   : > { %692 = vperm.xlu2 %2733, %v2565_v15  }
  0x69   : > { %697 = vperm.xlu1 %2732, %v2566_v14   ;;  %714 = vperm.xlu0 %2734, %v2568_v45   ;;  %v3319_v14 = vld [vmem:[%s4131_s1 + $0x8] sm:$0xff] }
  0x6a   : > { %709 = vperm.xlu2 %2733, %v2567_v19  }
  0x6c   : > { %v3210_v10 = vpop.permute.xlu2 %2648 }
  0x6d   : > { %v2651_v27 = vunpack.i.h.bf16 %v3210_v10  ;;  %v2650_v30 = vunpack.i.l.bf16 %v3210_v10 }
  0x6f   : > { %v418_v46 = vsel %vm417_vm2, %v2650_v30, %v2651_v27 }
  0x71   : > { %875 = vperm.xlu1 %2732, %v2575_v18   ;;  %1056 = vperm.xlu0 %2734, %v2585_v5  }
  0x72   : > { %1061 = vperm.xlu2 %2733, %v2586_v24   ;;  %v2587_v24 = vld [vmem:[%s4133_s3 + $0x30] sm:$0xff] }
  0x74   : > { %v3218_v13 = vpop.permute.xlu2 %415 }
  0x79   : > { %1078 = vperm.xlu1 %2732, %v2588_v23   ;;  %v2560_v23 = vld [vmem:[%s4131_s1 + $0x18] sm:$0xff]  ;;  %1073 = vperm.xlu0 %2734, %v2587_v24  }
  0x7a   : > { %880 = vperm.xlu2 %2733, %v2576_v42  }
  0x7c   : > { %v3236_v20 = vpop.permute.xlu2 %2663 }
  0x7d   : > { %v2666_v28 = vunpack.i.h.bf16 %v3236_v20  ;;  %v2665_v31 = vunpack.i.l.bf16 %v3236_v20  ;;  %v419_v20 = vsel %vm417_vm2, %v2651_v27, %v3218_v13 }
  0x81   : > { %897 = vperm.xlu1 %2732, %v2578_v38  }
  0x82   : > { %892 = vperm.xlu2 %2733, %v2577_v3  }
  0x83   : > { %v3226_v16 = vpop.permute.xlu1 %2638  ;;  %v3228_v17 = vpop.permute.xlu0 %2628 }
  0x84   : > { %v3251_v26 = vpop.permute.xlu2 %2678  ;;  %v2641_v43 = vunpack.i.h.bf16 %v3226_v16  ;;  %v2640_v44 = vunpack.i.l.bf16 %v3226_v16  ;;  %v2631_v48 = vunpack.i.h.bf16 %v3228_v17  ;;  %v2630_v49 = vunpack.i.l.bf16 %v3228_v17 }
  0x85   : > { %v2680_v29 = vunpack.i.l.bf16 %v3251_v26 }
  0x86   : > { %v395_v55 = vsel %vm394_vm3, %v2640_v44, %v2641_v43  ;;  %v376_v61 = vsel %vm375_vm4, %v2630_v49, %v2631_v48 }
  0x8b   : > { %v3238_v21 = vpop.permute.xlu1 %2643  ;;  %v3240_v22 = vpop.permute.xlu0 %2633 }
  0x8c   : > { %v3282_v50 = vpop.permute.xlu2 %2693  ;;  %v2636_v51 = vunpack.i.h.bf16 %v3240_v22  ;;  %v2645_v25 = vunpack.i.l.bf16 %v3238_v21 }
  0x8d   : > { %v2696_v54 = vunpack.i.h.bf16 %v3282_v50  ;;  %v2695_v59 = vunpack.i.l.bf16 %v3282_v50 }
  0x8e   : > { %v396_v13 = vsel %vm394_vm3, %v2641_v43, %v2645_v25  ;;  %v2579_v43 = vld [vmem:[%s4131_s1 + $0x30] sm:$0xff] }
  0x8f   : > { %v980_v6 = vsel %vm979_vm7, %v2695_v59, %v2696_v54 }
  0x93   : > { %v2659_v32 = vpop.permute.xlu1 %2658  ;;  %v2654_v33 = vpop.permute.xlu0 %2653 }
  0x94   : > { %v2661_v34 = vunpack.i.h.bf16 %v2659_v32  ;;  %v2660_v35 = vunpack.i.l.bf16 %v2659_v32  ;;  %v2656_v36 = vunpack.i.h.bf16 %v2654_v33  ;;  %v2655_v37 = vunpack.i.l.bf16 %v2654_v33  ;;  %v3314_v12 = vpop.permute.xlu2 %2708 }
  0x95   : > { %v2681_v33 = vunpack.i.h.bf16 %v3251_v26  ;;  %v2711_v26 = vunpack.i.h.bf16 %v3314_v12 }
  0x96   : > { %v437_v39 = vsel %vm436_vm0, %v2655_v37, %v2666_v28  ;;  %v616_v40 = vsel %vm615_vm1, %v2660_v35, %v2661_v34  ;;  %v617_v41 = vsel %vm615_vm1, %v2661_v34, %v2680_v29  ;;  %v597_v47 = vsel %vm436_vm0, %v2656_v36, %v2665_v31 }
  0x97   : > { %473 = vmatpush.msra.mxu0 %v437_v39  ;;  %652 = vmatpush.msra.mxu2 %v616_v40  ;;  %v2710_v37 = vunpack.i.l.bf16 %v3314_v12 }
  0x98   : > { %675 = vmatpush.msra.mxu3 %v617_v41 }
  0x99   : > { %474 = vmatpush.msra.mxu0 %v418_v46  ;;  %653 = vmatpush.msra.mxu2 %v597_v47  ;;  %v921_v46 = vsel %vm920_vm8, %v2710_v37, %v2711_v26 }
  0x9b   : > { %v2674_v52 = vpop.permute.xlu1 %2673  ;;  %v2669_v53 = vpop.permute.xlu0 %2668  ;;  %475 = vmatpush.msra.mxu0 %v3176_v0  ;;  %654 = vmatpush.msra.mxu2 %v3176_v0 }
  0x9c   : > { %v2676_v56 = vunpack.i.h.bf16 %v2674_v52  ;;  %v2675_v57 = vunpack.i.l.bf16 %v2674_v52  ;;  %v2670_v58 = vunpack.i.l.bf16 %v2669_v53  ;;  %v2671_v15 = vunpack.i.h.bf16 %v2669_v53  ;;  %v3355_v36 = vpop.permute.xlu2 %2718 }
  0x9d   : > { %476 = vmatpush.msra.mxu0 %v395_v55  ;;  %v2721_v17 = vunpack.i.h.bf16 %v3355_v36  ;;  %v2720_v39 = vunpack.i.l.bf16 %v3355_v36 }
  0x9e   : > { %v575_v62 = vsel %vm375_vm4, %v2636_v51, %v2670_v58  ;;  %v557_v63 = vsel %vm556_vm5, %v2675_v57, %v2676_v56  ;;  %v576_v30 = vsel %vm375_vm4, %v2670_v58, %v2671_v15  ;;  %v2580_v58 = vld [vmem:[%s4131_s1 + $0x38] sm:$0xff] }
  0x9f   : > { %477 = vmatpush.msra.mxu0 %v376_v61  ;;  %655 = vmatpush.msra.mxu2 %v575_v62  ;;  %v780_v52 = vsel %vm779_vm10, %v2720_v39, %v2721_v17 }
  0xa0   : > { %2555 = vmatmul.msk.f32.vlgmr.msra.gmra.mxu0 %vm455_vm6, %v443_v60 }
  0xa1   : > { %656 = vmatpush.msra.mxu2 %v557_v63 }
  0xa2   : > { %2561 = vmatmul.msk.f32.vlgmr.msra.gmra.mxu2 %vm455_vm6, %v2559_v4 }
  0xa3   : > { %v2689_v7 = vpop.permute.xlu1 %2688  ;;  %v2684_v8 = vpop.permute.xlu0 %2683  ;;  %1016 = vmatpush.msrb.mxu2 %v980_v6 }
  0xa4   : > { %v2686_v9 = vunpack.i.h.bf16 %v2684_v8  ;;  %v2685_v11 = vunpack.i.l.bf16 %v2684_v8  ;;  %v2690_v29 = vunpack.i.l.bf16 %v2689_v7  ;;  %v2691_v16 = vunpack.i.h.bf16 %v2689_v7  ;;  %v2729_v50 = vpop.permute.xlu2 %2728  ;;  %v2570_v8 = vld [vmem:[%s4131_s1 + $0x28] sm:$0xff] }
  0xa5   : > { %v2731_v53 = vunpack.i.h.bf16 %v2729_v50 }
  0xa6   : > { %v438_v18 = vsel %vm436_vm0, %v2666_v28, %v2686_v9  ;;  %v598_v19 = vsel %vm436_vm0, %v2665_v31, %v2685_v11  ;;  %v2635_v28 = vunpack.i.l.bf16 %v3240_v22  ;;  %v558_v27 = vsel %vm556_vm5, %v2676_v56, %v2690_v29 }
  0xa7   : > { %496 = vmatpush.msra.mxu1 %v438_v18  ;;  %676 = vmatpush.msra.mxu3 %v598_v19 }
  0xa8   : > { %2556 = vmatmul.msk.f32.gmra.mxu0 %vm455_vm6, %v3319_v14  ;;  %v377_v34 = vsel %vm375_vm4, %v2631_v48, %v2635_v28 }
  0xa9   : > { %497 = vmatpush.msra.mxu1 %v419_v20  ;;  %677 = vmatpush.msra.mxu3 %v3178_v1 }
  0xaa   : > { %2562 = vmatmul.msk.f32.gmra.mxu2 %vm455_vm6, %v2560_v23 }
  0xab   : > { %v2704_v31 = vpop.permute.xlu1 %2703  ;;  %v2699_v32 = vpop.permute.xlu0 %2698  ;;  %498 = vmatpush.msra.mxu1 %v3178_v1  ;;  %678 = vmatpush.msra.mxu3 %v576_v30 }
  0xac   : > { %v2700_v10 = vunpack.i.l.bf16 %v2699_v32  ;;  %v2705_v22 = vunpack.i.l.bf16 %v2704_v31  ;;  %v2701_v38 = vunpack.i.h.bf16 %v2699_v32  ;;  %v2706_v48 = vunpack.i.h.bf16 %v2704_v31  ;;  %v755_v7 = vpop.permute.xlu2 %754 }
  0xad   : > { %499 = vmatpush.msra.mxu1 %v396_v13  ;;  %679 = vmatpush.msra.mxu3 %v558_v27 }
  0xae   : > { %2563 = vmatmul.msk.f32.vlgmr.msra.gmra.mxu3 %vm455_vm6, %v2559_v4  ;;  %v961_v35 = vsel %vm615_vm1, %v2681_v33, %v2700_v10  ;;  %v939_v40 = vsel %vm556_vm5, %v2691_v16, %v2705_v22  ;;  %v962_v51 = vsel %vm615_vm1, %v2700_v10, %v2701_v38  ;;  %v940_v55 = vsel %vm556_vm5, %v2705_v22, %v2706_v48 }
  0xaf   : > { %500 = vmatpush.msra.mxu1 %v377_v34  ;;  %1017 = vmatpush.msrb.mxu2 %v961_v35 }
  0xb0   : > { %2557 = vmatmul.msk.f32.vlgmr.msra.gmra.mxu1 %vm455_vm6, %v443_v60 }
  0xb1   : > { %1018 = vmatpush.msrb.mxu2 %v3176_v0 }
  0xb3   : > { %v2714_v41 = vpop.permute.xlu1 %2713  ;;  %v978_v42 = vpop.permute.xlu0 %977  ;;  %1019 = vmatpush.msrb.mxu2 %v939_v40 }
  0xb4   : > { %v2716_v44 = vunpack.i.h.bf16 %v2714_v41  ;;  %v2715_v45 = vunpack.i.l.bf16 %v2714_v41  ;;  %v981_v47 = vsel %vm979_vm7, %v2696_v54, %v978_v42  ;;  %v2730_v54 = vunpack.i.l.bf16 %v2729_v50 }
  0xb5   : > { %1020 = vmatpush.msrb.mxu2 %v921_v46  ;;  %1039 = vmatpush.msrb.mxu3 %v981_v47 }
  0xb6   : > { %2564 = vmatmul.msk.f32.gmra.mxu3 %vm455_vm6, %v2560_v23  ;;  %2581 = vmatmul.msk.f32.vlgmr.msrb.gmra.mxu2 %vm455_vm6, %v2579_v43  ;;  %v799_v49 = vsel %vm798_vm9, %v2715_v45, %v2716_v44  ;;  %v738_v63 = vsel %vm737_vm12, %v2730_v54, %v2731_v53 }
  0xb7   : > { %835 = vmatpush.msrb.mxu0 %v799_v49  ;;  %1040 = vmatpush.msrb.mxu3 %v962_v51 }
  0xb8   : > { %2558 = vmatmul.msk.f32.gmra.mxu1 %vm455_vm6, %v3319_v14  ;;  %v518_v14 = vpop.permute.xlu2 %517 }
  0xb9   : > { %836 = vmatpush.msrb.mxu0 %v780_v52  ;;  %1041 = vmatpush.msrb.mxu3 %v3178_v1 }
  0xbb   : > { %v919_v56 = vpop.permute.xlu1 %918  ;;  %v2724_v57 = vpop.permute.xlu0 %2723  ;;  %1042 = vmatpush.msrb.mxu3 %v940_v55  ;;  %837 = vmatpush.msrb.mxu0 %v3176_v0  ;;  %v2569_v0 = vld [vmem:[%s4131_s1 + $0x20] sm:$0xff] }
  0xbc   : > { %v2726_v59 = vunpack.i.h.bf16 %v2724_v57  ;;  %v2725_v60 = vunpack.i.l.bf16 %v2724_v57  ;;  %v922_v61 = vsel %vm920_vm8, %v2711_v26, %v919_v56 }
  0xbd   : > { %1043 = vmatpush.msrb.mxu3 %v922_v61 }
  0xbe   : > { %2582 = vmatmul.msk.f32.gmra.mxu2 %vm455_vm6, %v2580_v58  ;;  %2583 = vmatmul.msk.f32.vlgmr.msrb.gmra.mxu3 %vm455_vm6, %v2579_v43  ;;  %v757_v62 = vsel %vm756_vm11, %v2725_v60, %v2726_v59  ;;  %v758_v9 = vsel %vm756_vm11, %v2726_v59, %v755_v7 }
  0xbf   : > { %838 = vmatpush.msrb.mxu0 %v757_v62 }
  0xc0   : > { %v693_v15 = vpop.permute.xlu2 %692 }
  0xc1   : > { %839 = vmatpush.msrb.mxu0 %v738_v63 }
  0xc2   : > { %2571 = vmatmul.msk.f32.vlgmr.msrb.gmra.mxu0 %vm455_vm6, %v2569_v0 }
  0xc3   : > { %v778_v3 = vpop.permute.xlu1 %777  ;;  %v797_v4 = vpop.permute.xlu0 %796 }
  0xc4   : > { %v800_v5 = vsel %vm798_vm9, %v2716_v44, %v797_v4  ;;  %v781_v6 = vsel %vm779_vm10, %v2721_v17, %v778_v3 }
  0xc5   : > { %858 = vmatpush.msrb.mxu1 %v800_v5 }
  0xc6   : > { %2584 = vmatmul.msk.f32.gmra.mxu3 %vm455_vm6, %v2580_v58 }
  0xc7   : > { %859 = vmatpush.msrb.mxu1 %v781_v6 }
  0xc8   : > { %v710_v23 = vpop.permute.xlu2 %709 }
  0xc9   : > { %860 = vmatpush.msrb.mxu1 %v3178_v1 }
  0xca   : > { %2572 = vmatmul.msk.f32.gmra.mxu0 %vm455_vm6, %v2570_v8 }
  0xcb   : > { %v736_v11 = vpop.permute.xlu0 %735  ;;  %861 = vmatpush.msrb.mxu1 %v758_v9  ;;  %v513_v19 = vpop.permute.xlu1 %512 }
  0xcc   : > { %v739_v12 = vsel %vm737_vm12, %v2731_v53, %v736_v11 }
  0xcd   : > { %862 = vmatpush.msrb.mxu1 %v739_v12 }
  0xce   : > { %2573 = vmatmul.msk.f32.vlgmr.msrb.gmra.mxu1 %vm455_vm6, %v2569_v0 }
  0xd0   : > { %v3412_v33 = vpop.permute.xlu2 %1061 }
  0xd3   : > { %v534_v20 = vpop.permute.xlu1 %533  ;;  %v529_v22 = vpop.permute.xlu0 %528 }
  0xd6   : > { %2574 = vmatmul.msk.f32.gmra.mxu1 %vm455_vm6, %v2570_v8 }
  0xd8   : > { %v881_v42 = vpop.permute.xlu2 %880 }
  0xdb   : > { %v698_v38 = vpop.permute.xlu1 %697  ;;  %v715_v48 = vpop.permute.xlu0 %714 }
  0xe0   : > { %v893_v54 = vpop.permute.xlu2 %892 }
  0xe3   : > { %v876_v49 = vpop.permute.xlu1 %875  ;;  %v1057_v59 = vpop.permute.xlu0 %1056 }
  0xeb   : > { %v1079_v5 = vpop.permute.xlu1 %1078  ;;  %v1074_v8 = vpop.permute.xlu0 %1073 }
 0x11d   : > { %v479_v18 = vpop.f32.mrf.mxu0 }
 0x11e   : > { %v520_v32 = vmul.f32 %v513_v19, %v479_v18 }
 0x120   : > { %v3416_v34 = vadd.f32 %v529_v22, %v520_v32 }
 0x122   : > { %v2740_v46 = vpack.i.bf16 %v3416_v34, %v4140_v2 }
 0x125   : > { %v658_v24 = vpop.f32.mrf.mxu2  ;;  %v482_v25 = vpop.f32.mrf.mxu0 }
 0x126   : > { %v700_v1 = vmul.f32 %v693_v15, %v658_v24  ;;  %v522_v28 = vmul.f32 %v518_v14, %v482_v25 }
 0x128   : > { %v3405_v29 = vadd.f32 %v710_v23, %v700_v1  ;;  %v3414_v13 = vadd.f32 %v534_v20, %v522_v28 }
 0x12a   : > { %v2755_v30 = vpack.i.bf16 %v3405_v29, %v4140_v2  ;;  %v2745_v31 = vpack.i.bf16 0.0, %v3405_v29  ;;  %v2760_v37 = vpack.i.bf16 0.0, %v3414_v13  ;;  %v2770_v56 = vpack.i.bf16 %v3414_v13, %v4140_v2 }
 0x12c   : > { %2756 = vrot.lane.b32.xlu2 %v2755_v30, %s3100_s16  ;;  %2746 = vrot.lane.b32.xlu0 %v2745_v31, %s3099_s15 }
 0x12d   : > { %v502_v10 = vpop.f32.mrf.mxu1  ;;  %v661_v43 = vpop.f32.mrf.mxu2 }
 0x12e   : > { %v521_v27 = vmul.f32 %v513_v19, %v502_v10  ;;  %v702_v45 = vmul.f32 %v698_v38, %v661_v43 }
 0x130   : > { %v3418_v35 = vadd.f32 %v529_v22, %v521_v27  ;;  %v3438_v51 = vadd.f32 %v715_v48, %v702_v45 }
 0x131   : > { %v681_v36 = vpop.f32.mrf.mxu3 }
 0x132   : > { %v701_v16 = vmul.f32 %v693_v15, %v681_v36  ;;  %v2735_v26 = vpack.i.bf16 %v3418_v35, %v3416_v34  ;;  %v2785_v57 = vpack.i.bf16 %v3438_v51, %v4140_v2  ;;  %v2775_v62 = vpack.i.bf16 0.0, %v3438_v51 }
 0x134   : > { %v3423_v17 = vadd.f32 %v710_v23, %v701_v16  ;;  %2736 = vrot.lane.b32.xlu1 %v2735_v26, %s3103_s19  ;;  %2761 = vrot.lane.b32.xlu2 %v2760_v37, %s3099_s15 }
 0x135   : > { %v505_v39 = vpop.f32.mrf.mxu1 }
 0x136   : > { %v523_v40 = vmul.f32 %v518_v14, %v505_v39  ;;  %v2750_v41 = vpack.i.bf16 %v3423_v17, %v3405_v29 }
 0x138   : > { %v3429_v44 = vadd.f32 %v534_v20, %v523_v40  ;;  %2751 = vrot.lane.b32.xlu0 %v2750_v41, %s3103_s19  ;;  %v898_v20 = vpop.permute.xlu1 %897 }
 0x139   : > { %v684_v52 = vpop.f32.mrf.mxu3  ;;  %v1022_v9 = vpop.f32.mrf.mxu2 }
 0x13a   : > { %v2765_v47 = vpack.i.bf16 %v3429_v44, %v3414_v13  ;;  %v703_v61 = vmul.f32 %v698_v38, %v684_v52  ;;  %v1064_v14 = vmul.f32 %v1057_v59, %v1022_v9 }
 0x13c   : > { %2741 = vrot.lane.b32.xlu1 %v2740_v46, %s3100_s16  ;;  %2766 = vrot.lane.b32.xlu2 %v2765_v47, %s3103_s19  ;;  %v3456_v6 = vadd.f32 %v715_v48, %v703_v61  ;;  %v3471_v1 = vadd.f32 %v1074_v8, %v1064_v14 }
 0x13e   : > { %v2780_v15 = vpack.i.bf16 %v3456_v6, %v3438_v51  ;;  %v2810_v32 = vpack.i.bf16 0.0, %v3471_v1  ;;  %v2820_v27 = vpack.i.bf16 %v3471_v1, %v4140_v2 }
 0x13f   : > { %v841_v50 = vpop.f32.mrf.mxu0 }
 0x140   : > { %v883_v53 = vmul.f32 %v876_v49, %v841_v50 }
 0x141   : > { %v1045_v60 = vpop.f32.mrf.mxu3  ;;  %v1025_v26 = vpop.f32.mrf.mxu2 }
 0x142   : > { %v3440_v55 = vadd.f32 %v893_v54, %v883_v53  ;;  %v1065_v0 = vmul.f32 %v1057_v59, %v1045_v60  ;;  %v1066_v39 = vmul.f32 %v3412_v33, %v1025_v26  ;;  %v2935_v60 = vpack.i.bf16 %v3416_v34, %v3414_v13 }
 0x144   : > { %2771 = vrot.lane.b32.xlu1 %v2770_v56, %s3100_s16  ;;  %2786 = vrot.lane.b32.xlu2 %v2785_v57, %s3100_s16  ;;  %v2790_v58 = vpack.i.bf16 0.0, %v3440_v55  ;;  %v3454_v4 = vpack.i.bf16 %v3440_v55, %v4140_v2  ;;  %v3462_v11 = vadd.f32 %v1074_v8, %v1065_v0  ;;  %v3505_v43 = vadd.f32 %v1079_v5, %v1066_v39 }
 0x145   : > { %v2905_v57 = vpack.i.bf16 0.0, %v3418_v35 }
 0x146   : > { %2791 = vrot.lane.b32.xlu0 %v2790_v58, %s3099_s15  ;;  %v2825_v24 = vpack.i.bf16 0.0, %v3462_v11  ;;  %v2815_v22 = vpack.i.bf16 %v3462_v11, %v3471_v1  ;;  %v2855_v46 = vpack.i.bf16 0.0, %v3505_v43  ;;  %v2895_v50 = vpack.i.bf16 %v3505_v43, %v4140_v2 }
 0x147   : > { %v844_v18 = vpop.f32.mrf.mxu0  ;;  %v2915_v59 = vpack.i.bf16 %v3456_v6, %v3505_v43 }
 0x148   : > { %v885_v25 = vmul.f32 %v881_v42, %v844_v18 }
 0x149   : > { %v1048_v16 = vpop.f32.mrf.mxu3 }
 0x14a   : > { %v3478_v31 = vadd.f32 %v898_v20, %v885_v25  ;;  %v1067_v37 = vmul.f32 %v3412_v33, %v1048_v16  ;;  %v2870_v33 = vpack.i.bf16 %v3429_v44, %v3423_v17  ;;  %v1792_v25 = vld [vmem:[%s4135_s5 + $0x18] sm:$0xff] }
 0x14b   : > { %v864_v63 = vpop.f32.mrf.mxu1 }
 0x14c   : > { %v884_v3 = vmul.f32 %v876_v49, %v864_v63  ;;  %2776 = vrot.lane.b32.xlu1 %v2775_v62, %s3099_s15  ;;  %v2830_v38 = vpack.i.bf16 0.0, %v3478_v31  ;;  %v2840_v40 = vpack.i.bf16 %v3478_v31, %v4140_v2  ;;  %v3501_v41 = vadd.f32 %v1079_v5, %v1067_v37 }
 0x14d   : > { %v2880_v49 = vpack.i.bf16 0.0, %v3423_v17  ;;  %v2890_v52 = vpack.i.bf16 %v3429_v44, %v3478_v31  ;;  %v2920_v63 = vpack.i.bf16 %v3405_v29, %v3438_v51  ;;  %v2950_v5 = vpack.i.bf16 %v3418_v35, %v3429_v44 }
 0x14e   : > { %v3458_v7 = vadd.f32 %v893_v54, %v884_v3  ;;  %2801 = vrot.lane.b32.xlu0 %v3454_v4, %s3100_s16  ;;  %v2860_v45 = vpack.i.bf16 %v3501_v41, %v3505_v43  ;;  %v2885_v48 = vpack.i.bf16 %v3501_v41, %v3416_v34  ;;  %v2910_v54 = vpack.i.bf16 0.0, %v3501_v41 }
 0x14f   : > { %v2925_v58 = vpack.i.bf16 %v3462_v11, %v3501_v41 }
 0x150   : > { %v2795_v12 = vpack.i.bf16 %v3458_v7, %v3440_v55  ;;  %v2805_v30 = vpack.i.bf16 %v3456_v6, %v3458_v7  ;;  %v2865_v47 = vpack.i.bf16 0.0, %v3458_v7 }
 0x152   : > { %2796 = vrot.lane.b32.xlu2 %v2795_v12, %s3103_s19  ;;  %v2940_v12 = vpack.i.bf16 %v3423_v17, %v3456_v6 }
 0x153   : > { %v867_v19 = vpop.f32.mrf.mxu1 }
 0x154   : > { %v886_v23 = vmul.f32 %v881_v42, %v867_v19  ;;  %2781 = vrot.lane.b32.xlu1 %v2780_v15, %s3103_s19  ;;  %v1790_v19 = vld [vmem:[%s4135_s5 + $0x8] sm:$0xff] }
 0x156   : > { %2826 = vrot.lane.b32.xlu0 %v2825_v24, %s3101_s17  ;;  %v3474_v28 = vadd.f32 %v898_v20, %v886_v23  ;;  %v1791_v24 = vld [vmem:[%s4135_s5 + $0x10] sm:$0xff] }
 0x158   : > { %v2835_v10 = vpack.i.bf16 %v3474_v28, %v3478_v31  ;;  %v2845_v36 = vpack.i.bf16 %v3474_v28, %v3462_v11  ;;  %v2850_v42 = vpack.i.bf16 0.0, %v3474_v28  ;;  %v2930_v62 = vpack.i.bf16 %v3458_v7, %v3474_v28 }
 0x15a   : > { %2806 = vrot.lane.b32.xlu2 %v2805_v30, %s3099_s15 }
 0x15c   : > { %2811 = vrot.lane.b32.xlu1 %v2810_v32, %s3099_s15 }
 0x15e   : > { %2836 = vrot.lane.b32.xlu0 %v2835_v10, %s3103_s19  ;;  %v1789_v10 = vld [vmem:[%s4135_s5] sm:$0xff] }
 0x162   : > { %2821 = vrot.lane.b32.xlu2 %v2820_v27, %s3100_s16 }
 0x164   : > { %2816 = vrot.lane.b32.xlu1 %v2815_v22, %s3103_s19 }
 0x166   : > { %2846 = vrot.lane.b32.xlu0 %v2845_v36, %s3099_s15 }
 0x16a   : > { %2831 = vrot.lane.b32.xlu2 %v2830_v38, %s3099_s15 }
 0x16c   : > { %2841 = vrot.lane.b32.xlu1 %v2840_v40, %s3100_s16 }
 0x16e   : > { %2851 = vrot.lane.b32.xlu0 %v2850_v42, %s3101_s17 }
 0x172   : > { %2861 = vrot.lane.b32.xlu2 %v2860_v45, %s3103_s19 }
 0x174   : > { %2871 = vrot.lane.b32.xlu1 %v2870_v33, %s3099_s15 }
 0x176   : > { %2856 = vrot.lane.b32.xlu0 %v2855_v46, %s3099_s15 }
 0x17a   : > { %2866 = vrot.lane.b32.xlu2 %v2865_v47, %s3101_s17 }
 0x17c   : > { %2886 = vrot.lane.b32.xlu1 %v2885_v48, %s3099_s15 }
 0x17e   : > { %2881 = vrot.lane.b32.xlu0 %v2880_v49, %s3101_s17 }
 0x182   : > { %2876 = vrot.lane.b32.xlu2 %v2820_v27, %s3101_s17 }
 0x184   : > { %2891 = vrot.lane.b32.xlu1 %v2890_v52, %s3101_s17 }
 0x186   : > { %v3529_v53 = vpop.permute.xlu2 %2756  ;;  %2896 = vrot.lane.b32.xlu0 %v2895_v50, %s3100_s16 }
 0x18a   : > { %1285 = vrot.lane.b32.xlu2 %v3418_v35, %s3099_s15 }
 0x18c   : > { %2911 = vrot.lane.b32.xlu1 %v2910_v54, %s3101_s17 }
 0x18e   : > { %2901 = vrot.lane.b32.xlu0 %v3454_v4, %s3101_s17  ;;  %v3538_v56 = vpop.permute.xlu2 %2761 }
 0x18f   : > { %v2763_v3 = vunpack.i.l.bf16 %v3538_v56 }
 0x192   : > { %2906 = vrot.lane.b32.xlu2 %v2905_v57, %s3101_s17 }
 0x194   : > { %2926 = vrot.lane.b32.xlu1 %v2925_v58, %s3100_s16 }
 0x196   : > { %2916 = vrot.lane.b32.xlu0 %v2915_v59, %s3101_s17  ;;  %v3550_v61 = vpop.permute.xlu2 %2766 }
 0x19a   : > { %2936 = vrot.lane.b32.xlu2 %v2935_v60, %s3101_s17 }
 0x19c   : > { %2931 = vrot.lane.b32.xlu1 %v2930_v62, %s3100_s16 }
 0x19e   : > { %v3558_v0 = vpop.permute.xlu0 %2746  ;;  %2921 = vrot.lane.b32.xlu0 %v2920_v63, %s3101_s17  ;;  %v3571_v9 = vpop.permute.xlu2 %2786 }
 0x19f   : > { %v2749_v4 = vunpack.i.h.bf16 %v3558_v0 }
 0x1a1   : > { %v3568_v8 = vsel %vm394_vm3, %v2749_v4, %v2763_v3 }
 0x1a2   : > { %2951 = vrot.lane.b32.xlu2 %v2950_v5, %s3100_s16 }
 0x1a4   : > { %2946 = vrot.lane.b32.xlu1 %v4140_v2, %s3103_s19 }
 0x1a6   : > { %v3577_v14 = vpop.permute.xlu1 %2736  ;;  %2941 = vrot.lane.b32.xlu0 %v2940_v12, %s3100_s16 }
 0x1aa   : > { %2966 = vrot.lane.b32.xlu2 %v4140_v2, %s3103_s19  ;;  %v3593_v23 = vpop.permute.xlu0 %2751 }
 0x1ab   : > { %v4144_v63 = vunpack.i.h.bf16 %v3593_v23  ;;  %v2753_v4 = vunpack.i.l.bf16 %v3593_v23 }
 0x1ac   : > { %2961 = vrot.lane.b32.xlu1 %v4140_v2, %s3103_s19  ;;  %v3584_v15 = vpop.permute.xlu2 %2796 }
 0x1ad   : > { %v4146_v54 = vunpack.i.h.bf16 %v3584_v15  ;;  %v2798_v57 = vunpack.i.l.bf16 %v3584_v15 }
 0x1ae   : > { %v3586_v18 = vpop.permute.xlu1 %2741  ;;  %2956 = vrot.lane.b32.xlu0 %v4140_v2, %s3103_s19 }
 0x1af   : > { %v1657_v5 = vsel %vm436_vm0, %v2798_v57, %v4146_v54 }
 0x1b2   : > { %1800 = vperm.xlu2 %2733, %v1790_v19   ;;  %v4143_v19 = vunpack.i.h.bf16 %v3550_v61 }
 0x1b4   : > { %1805 = vperm.xlu1 %2732, %v1791_v24   ;;  %v3601_v20 = vpop.permute.xlu2 %2806  ;;  %v2768_v24 = vunpack.i.l.bf16 %v3550_v61 }
 0x1b6   : > { %1810 = vperm.xlu0 %2734, %v1792_v25   ;;  %v3603_v30 = vpop.permute.xlu1 %2771 }
 0x1b8   : > { %v3605_v32 = vpop.permute.xlu0 %2791 }
 0x1bc   : > { %v3610_v27 = vpop.permute.xlu2 %2821 }
 0x1be   : > { %1795 = vperm.xlu0 %2734, %v1789_v10   ;;  %v3612_v22 = vpop.permute.xlu1 %2776 }
 0x1c0   : > { %v3614_v36 = vpop.permute.xlu0 %2801 }
 0x1c4   : > { %v3616_v16 = vpop.permute.xlu2 %2831 }
 0x1c5   : > { %v2834_v2 = vunpack.i.h.bf16 %v3616_v16 }
 0x1c6   : > { %v3618_v26 = vpop.permute.xlu1 %2781 }
 0x1c7   : > { %v4145_v59 = vunpack.i.h.bf16 %v3618_v26  ;;  %v2783_v60 = vunpack.i.l.bf16 %v3618_v26 }
 0x1c8   : > { %v3620_v37 = vpop.permute.xlu0 %2826 }
 0x1c9   : > { %v1655_v25 = vsel %vm436_vm0, %v2783_v60, %v4145_v59 }
 0x1cc   : > { %v3622_v38 = vpop.permute.xlu2 %2861 }
 0x1cd   : > { %v4149_v39 = vunpack.i.h.bf16 %v3622_v38  ;;  %v2863_v40 = vunpack.i.l.bf16 %v3622_v38 }
 0x1ce   : > { %v3626_v42 = vpop.permute.xlu1 %2811 }
 0x1cf   : > { %v1663_v45 = vsel %vm436_vm0, %v2863_v40, %v4149_v39  ;;  %v4142_v40 = vunpack.i.h.bf16 %v3577_v14 }
 0x1d0   : > { %v3631_v33 = vpop.permute.xlu0 %2836  ;;  %1892 = vmatpush.msra.mxu2 %v1663_v45  ;;  %v2738_v45 = vunpack.i.l.bf16 %v3577_v14 }
 0x1d1   : > { %v4147_v47 = vunpack.i.h.bf16 %v3631_v33  ;;  %v2838_v48 = vunpack.i.l.bf16 %v3631_v33 }
 0x1d2   : > { %v1649_v57 = vsel %vm436_vm0, %v2738_v45, %v4142_v40  ;;  %v2814_v45 = vunpack.i.h.bf16 %v3626_v42  ;;  %v2833_v40 = vunpack.i.l.bf16 %v3616_v16 }
 0x1d3   : > { %v1659_v62 = vsel %vm436_vm0, %v2838_v48, %v4147_v47  ;;  %v1653_v48 = vsel %vm436_vm0, %v2753_v4, %v4144_v63 }
 0x1d4   : > { %v3681_v60 = vpop.permute.xlu2 %2866  ;;  %v1339_v16 = vsel %vm394_vm3, %v2814_v45, %v2833_v40  ;;  %v2748_v45 = vunpack.i.l.bf16 %v3558_v0  ;;  %v2809_v0 = vunpack.i.h.bf16 %v3601_v20 }
 0x1d6   : > { %v3633_v46 = vpop.permute.xlu1 %2816 }
 0x1d7   : > { %v4148_v49 = vunpack.i.h.bf16 %v3633_v46  ;;  %v2818_v52 = vunpack.i.l.bf16 %v3633_v46 }
 0x1d8   : > { %v3639_v50 = vpop.permute.xlu0 %2846 }
 0x1d9   : > { %v1661_v58 = vsel %vm436_vm0, %v2818_v52, %v4148_v49  ;;  %v1651_v52 = vsel %vm436_vm0, %v2768_v24, %v4143_v19  ;;  %v3697_v19 = vld [vmem:[%s4134_s4 + $0x28] sm:$0xff]  ;;  %v2849_v54 = vunpack.i.h.bf16 %v3639_v50 }
 0x1da   : > { %1893 = vmatpush.msra.mxu2 %v1661_v58  ;;  %v3679_v58 = vld [vmem:[%s4134_s4 + $0x10] sm:$0xff] }
 0x1dc   : > { %1894 = vmatpush.msra.mxu2 %v1659_v62  ;;  %v3709_v63 = vpop.permute.xlu2 %2876 }
 0x1de   : > { %v3656_v12 = vpop.permute.xlu1 %2841  ;;  %1895 = vmatpush.msra.mxu2 %v1657_v5  ;;  %v2646_v5 = vunpack.i.h.bf16 %v3238_v21  ;;  %v2793_v21 = vunpack.i.l.bf16 %v3605_v32 }
 0x1e0   : > { %v3663_v10 = vpop.permute.xlu0 %2851  ;;  %1896 = vmatpush.msra.mxu2 %v1655_v25  ;;  %v1337_v47 = vsel %vm394_vm3, %v2834_v2, %v2793_v21  ;;  %v1340_v2 = vsel %vm394_vm3, %v2833_v40, %v2849_v54  ;;  %v2824_v54 = vunpack.i.h.bf16 %v3610_v27  ;;  %v2823_v40 = vunpack.i.l.bf16 %v3610_v27 }
 0x1e2   : > { %1897 = vmatpush.msra.mxu2 %v1653_v48  ;;  %v2813_v48 = vunpack.i.l.bf16 %v3626_v42  ;;  %v2778_v42 = vunpack.i.l.bf16 %v3612_v22 }
 0x1e4   : > { %1898 = vmatpush.msra.mxu2 %v1651_v52 }
 0x1e6   : > { %v3683_v62 = vpop.permute.xlu1 %2871  ;;  %1899 = vmatpush.msra.mxu2 %v1649_v57 }
 0x1e7   : > { %2589 = vmatmul.msk.f32.vlgmr.msra.gmra.mxu2 %vm1813_vm13, %v3679_v58 }
 0x1e8   : > { %v2857_v4 = vpop.permute.xlu0 %2856 }
 0x1e9   : > { %v2859_v24 = vunpack.i.h.bf16 %v2857_v4  ;;  %v2858_v25 = vunpack.i.l.bf16 %v2857_v4 }
 0x1eb   : > { %v1343_v52 = vsel %vm394_vm3, %v2646_v5, %v2858_v25  ;;  %v1341_v57 = vsel %vm394_vm3, %v2859_v24, %v2813_v48  ;;  %v2848_v5 = vunpack.i.l.bf16 %v3639_v50  ;;  %v2794_v24 = vunpack.i.h.bf16 %v3605_v32 }
 0x1ec   : > { %1826 = vmatpush.msra.mxu0 %v1343_v52 }
 0x1ed   : > { %v1342_v39 = vsel %vm394_vm3, %v2813_v48, %v2848_v5  ;;  %v1335_v32 = vsel %vm394_vm3, %v2794_v24, %v2778_v42  ;;  %v2874_v5 = vunpack.i.h.bf16 %v3683_v62 }
 0x1ee   : > { %v3700_v4 = vpop.permute.xlu1 %2886  ;;  %1827 = vmatpush.msra.mxu0 %v1341_v57  ;;  %v2779_v57 = vunpack.i.h.bf16 %v3612_v22 }
 0x1ef   : > { %v2889_v52 = vunpack.i.h.bf16 %v3700_v4  ;;  %2590 = vmatmul.msk.f32.gmra.mxu2 %vm1813_vm13, %v3697_v19  ;;  %v2888_v22 = vunpack.i.l.bf16 %v3700_v4 }
 0x1f0   : > { %v3711_v59 = vpop.permute.xlu0 %2881  ;;  %1828 = vmatpush.msra.mxu0 %v1339_v16  ;;  %v2808_v16 = vunpack.i.l.bf16 %v3601_v20  ;;  %v1333_v50 = vsel %vm394_vm3, %v2779_v57, %v2748_v45  ;;  %v1336_v20 = vsel %vm394_vm3, %v2778_v42, %v2809_v0  ;;  %v1286_v57 = vpop.permute.xlu2 %1285  ;;  %v1332_v0 = vsel %vm394_vm3, %v2763_v3, %v2874_v5 }
 0x1f1   : > { %v1344_v49 = vsel %vm394_vm3, %v2858_v25, %v2889_v52  ;;  %v2873_v25 = vunpack.i.l.bf16 %v3683_v62  ;;  %v4150_v62 = vunpack.i.h.bf16 %v3614_v36  ;;  %v1330_v5 = vsel %vm394_vm3, %v2888_v22, %v1286_v57 }
 0x1f2   : > { %1829 = vmatpush.msra.mxu0 %v1337_v47  ;;  %1913 = vmatpush.msra.mxu3 %v1344_v49  ;;  %v3727_v47 = vld [vmem:[%s4134_s4 + $0x40] sm:$0xff]  ;;  %v1338_v48 = vsel %vm394_vm3, %v2793_v21, %v2808_v16  ;;  %v2843_v16 = vunpack.i.l.bf16 %v3656_v12  ;;  %v2774_v57 = vunpack.i.h.bf16 %v3603_v30 }
 0x1f3   : > { %v1334_v42 = vsel %vm394_vm3, %v2748_v45, %v2873_v25  ;;  %v4151_v45 = vunpack.i.h.bf16 %v3571_v9  ;;  %v2788_v25 = vunpack.i.l.bf16 %v3571_v9 }
 0x1f4   : > { %1914 = vmatpush.msra.mxu3 %v1342_v39  ;;  %1830 = vmatpush.msra.mxu0 %v1335_v32  ;;  %v2764_v39 = vunpack.i.h.bf16 %v3538_v56  ;;  %v4152_v32 = vunpack.i.h.bf16 %v3656_v12 }
 0x1f6   : > { %v3730_v49 = vpop.permute.xlu1 %2891  ;;  %1831 = vmatpush.msra.mxu0 %v1333_v50  ;;  %1915 = vmatpush.msra.mxu3 %v1340_v2  ;;  %v1329_v24 = vsel %vm394_vm3, %v2764_v39, %v2888_v22  ;;  %v2803_v50 = vunpack.i.l.bf16 %v3614_v36  ;;  %v1197_v2 = vsel %vm375_vm4, %v2823_v40, %v2824_v54  ;;  %v3764_v39 = vld [vmem:[%s4134_s4 + $0x58] sm:$0xff]  ;;  %v1195_v3 = vsel %vm375_vm4, %v2843_v16, %v4152_v32 }
 0x1f7   : > { %2591 = vmatmul.msk.f32.gmra.mxu2 %vm1813_vm13, %v3727_v47 }
 0x1f8   : > { %v3739_v4 = vpop.permute.xlu0 %2896  ;;  %1832 = vmatpush.msra.mxu0 %v3568_v8  ;;  %1916 = vmatpush.msra.mxu3 %v1338_v48  ;;  %v2829_v48 = vunpack.i.h.bf16 %v3620_v37  ;;  %v1193_v16 = vsel %vm375_vm4, %v2803_v50, %v4150_v62  ;;  %v2743_v62 = vunpack.i.l.bf16 %v3586_v18 }
 0x1f9   : > { %v2899_v52 = vunpack.i.h.bf16 %v3739_v4  ;;  %v2898_v21 = vunpack.i.l.bf16 %v3739_v4 }
 0x1fa   : > { %1833 = vmatpush.msra.mxu0 %v1329_v24  ;;  %1917 = vmatpush.msra.mxu3 %v1336_v20  ;;  %v4153_v20 = vunpack.i.l.bf16 %v3620_v37  ;;  %v2759_v24 = vunpack.i.h.bf16 %v3529_v53 }
 0x1fb   : > { %v1199_v8 = vsel %vm375_vm4, %v2898_v21, %v2899_v52 }
 0x1fc   : > { %1834 = vmatpush.msra.mxu0 %v1199_v8  ;;  %1918 = vmatpush.msra.mxu3 %v1334_v42  ;;  %v2758_v8 = vunpack.i.l.bf16 %v3529_v53  ;;  %v1518_v50 = vsel %vm417_vm2, %v4153_v20, %v2829_v48 }
 0x1fe   : > { %v2912_v21 = vpop.permute.xlu1 %2911  ;;  %1835 = vmatpush.msra.mxu0 %v1197_v2  ;;  %1919 = vmatpush.msra.mxu3 %v1332_v0  ;;  %v2854_v2 = vunpack.i.h.bf16 %v3663_v10  ;;  %v2853_v0 = vunpack.i.l.bf16 %v3663_v10  ;;  %v2868_v10 = vunpack.i.l.bf16 %v3681_v60 }
 0x1ff   : > { %v2914_v40 = vunpack.i.h.bf16 %v2912_v21  ;;  %v2913_v56 = vunpack.i.l.bf16 %v2912_v21  ;;  %2592 = vmatmul.msk.f32.gmra.mxu2 %vm1813_vm13, %v3764_v39  ;;  %v1191_v21 = vsel %vm375_vm4, %v2788_v25, %v4151_v45  ;;  %v1189_v25 = vsel %vm375_vm4, %v2758_v8, %v2759_v24 }
 0x200   : > { %v3778_v42 = vpop.permute.xlu0 %2901  ;;  %1836 = vmatpush.msra.mxu0 %v1195_v3  ;;  %1920 = vmatpush.msra.mxu3 %v1330_v5  ;;  %v2773_v3 = vunpack.i.l.bf16 %v3603_v30  ;;  %v2869_v5 = vunpack.i.h.bf16 %v3681_v60  ;;  %v4160_v30 = vunpack.i.h.bf16 %v3631_v33  ;;  %v4162_v33 = vunpack.i.h.bf16 %v3618_v26 }
 0x201   : > { %v1520_v22 = vsel %vm417_vm2, %v2913_v56, %v2914_v40  ;;  %v2744_v40 = vunpack.i.h.bf16 %v3586_v18 }
 0x202   : > { %1837 = vmatpush.msra.mxu0 %v1193_v16  ;;  %1942 = vmatpush.msrb.mxu2 %v1520_v22  ;;  %v3798_v16 = vpop.permute.xlu2 %2906  ;;  %v1516_v22 = vsel %vm417_vm2, %v2853_v0, %v2854_v2  ;;  %v1187_v48 = vsel %vm375_vm4, %v2773_v3, %v2774_v57  ;;  %v1514_v20 = vsel %vm417_vm2, %v2868_v10, %v2869_v5  ;;  %v3815_v2 = vld [vmem:[%s4134_s4] sm:$0xff] }
 0x203   : > { %v1185_v8 = vsel %vm375_vm4, %v2743_v62, %v2744_v40  ;;  %v2893_v62 = vunpack.i.l.bf16 %v3730_v49 }
 0x204   : > { %1838 = vmatpush.msra.mxu0 %v1191_v21  ;;  %1943 = vmatpush.msrb.mxu2 %v1518_v50  ;;  %v2879_v21 = vunpack.i.h.bf16 %v3709_v63 }
 0x206   : > { %v2927_v45 = vpop.permute.xlu1 %2926  ;;  %1839 = vmatpush.msra.mxu0 %v1189_v25  ;;  %1944 = vmatpush.msrb.mxu2 %v1516_v22  ;;  %v2884_v22 = vunpack.i.h.bf16 %v3711_v59 }
 0x207   : > { %v2929_v60 = vunpack.i.h.bf16 %v2927_v45  ;;  %v2928_v32 = vunpack.i.l.bf16 %v2927_v45  ;;  %v2878_v45 = vunpack.i.l.bf16 %v3709_v63 }
 0x208   : > { %v2917_v50 = vpop.permute.xlu0 %2916  ;;  %1840 = vmatpush.msra.mxu0 %v1187_v48  ;;  %1945 = vmatpush.msrb.mxu2 %v1514_v20  ;;  %v2883_v20 = vunpack.i.l.bf16 %v3711_v59  ;;  %v2904_v59 = vunpack.i.h.bf16 %v3778_v42 }
 0x209   : > { %v2919_v25 = vunpack.i.h.bf16 %v2917_v50  ;;  %v2918_v3 = vunpack.i.l.bf16 %v2917_v50  ;;  %v1200_v5 = vsel %vm375_vm4, %v2899_v52, %v2928_v32  ;;  %v1198_v63 = vsel %vm375_vm4, %v2824_v54, %v2929_v60 }
 0x20a   : > { %1841 = vmatpush.msra.mxu0 %v1185_v8  ;;  %1921 = vmatpush.msra.mxu3 %v1200_v5  ;;  %v2903_v52 = vunpack.i.l.bf16 %v3778_v42  ;;  %v4154_v32 = vunpack.i.l.bf16 %v3620_v37  ;;  %v2909_v8 = vunpack.i.h.bf16 %v3798_v16  ;;  %v2937_v27 = vpop.permute.xlu2 %2936  ;;  %v2894_v54 = vunpack.i.h.bf16 %v3730_v49 }
 0x20b   : > { %1842 = vmatmul.f32.vlgmr.msra.gmra.mxu0 %v3815_v2  ;;  %v1519_v48 = vsel %vm417_vm2, %v2918_v3, %v2913_v56  ;;  %v1512_v4 = vsel %vm417_vm2, %v2919_v25, %v2878_v45  ;;  %v2908_v56 = vunpack.i.l.bf16 %v3798_v16  ;;  %v1510_v45 = vsel %vm417_vm2, %v2883_v20, %v2884_v22  ;;  %v3844_v16 = vld [vmem:[%s4134_s4 + $0x18] sm:$0xff] }
 0x20c   : > { %1855 = vmatpush.msra.mxu1 %v1519_v48  ;;  %1922 = vmatpush.msra.mxu3 %v1198_v63  ;;  %v1517_v50 = vsel %vm417_vm2, %v2879_v21, %v4154_v32  ;;  %v1515_v42 = vsel %vm417_vm2, %v2893_v62, %v2853_v0  ;;  %v1508_v37 = vsel %vm417_vm2, %v2894_v54, %v2903_v52  ;;  %v4155_v22 = vunpack.i.h.bf16 %v3656_v12 }
 0x20d   : > { %1946 = vmatpush.msrb.mxu2 %v1512_v4  ;;  %v1513_v63 = vsel %vm417_vm2, %v2904_v59, %v2868_v10  ;;  %v1506_v0 = vsel %vm417_vm2, %v2908_v56, %v2909_v8  ;;  %v4156_v52 = vunpack.i.h.bf16 %v3614_v36  ;;  %v2939_v10 = vunpack.i.h.bf16 %v2937_v27 }
 0x20e   : > { %v2932_v60 = vpop.permute.xlu1 %2931  ;;  %1856 = vmatpush.msra.mxu1 %v1517_v50  ;;  %v2938_v59 = vunpack.i.l.bf16 %v2937_v27 }
 0x20f   : > { %v2934_v3 = vunpack.i.h.bf16 %v2932_v60  ;;  %v2933_v5 = vunpack.i.l.bf16 %v2932_v60  ;;  %1947 = vmatpush.msrb.mxu2 %v1510_v45 }
 0x210   : > { %v2922_v48 = vpop.permute.xlu0 %2921  ;;  %1857 = vmatpush.msra.mxu1 %v1515_v42  ;;  %v1507_v60 = vsel %vm417_vm2, %v2938_v59, %v2894_v54  ;;  %v4158_v42 = vunpack.i.h.bf16 %v3571_v9 }
 0x211   : > { %v2924_v21 = vunpack.i.h.bf16 %v2922_v48  ;;  %v2923_v49 = vunpack.i.l.bf16 %v2922_v48  ;;  %1948 = vmatpush.msrb.mxu2 %v1508_v37  ;;  %v1196_v4 = vsel %vm375_vm4, %v4155_v22, %v2933_v5  ;;  %v1194_v32 = vsel %vm375_vm4, %v4156_v52, %v2934_v3  ;;  %v3863_v3 = vld [vmem:[%s4134_s4 + $0x30] sm:$0xff] }
 0x212   : > { %1858 = vmatpush.msra.mxu1 %v1513_v63  ;;  %1923 = vmatpush.msra.mxu3 %v1196_v4  ;;  %v4157_v5 = vunpack.i.h.bf16 %v3622_v38  ;;  %v4163_v37 = vunpack.i.h.bf16 %v3593_v23 }
 0x213   : > { %1949 = vmatpush.msrb.mxu2 %v1506_v0  ;;  %1845 = vmatmul.f32.gmra.mxu0 %v3844_v16  ;;  %v1511_v62 = vsel %vm417_vm2, %v2923_v49, %v2919_v25  ;;  %v1509_v12 = vsel %vm417_vm2, %v2924_v21, %v2883_v20  ;;  %v2952_v25 = vpop.permute.xlu2 %2951  ;;  %v1505_v20 = vsel %vm417_vm2, %v2939_v10, %v2908_v56  ;;  %v1704_v21 = vld [vmem:[%s4134_s4 + $0x38] sm:$0xff]  ;;  %v4166_v49 = vmov 0.0  }
 0x214   : > { %1859 = vmatpush.msra.mxu1 %v1511_v62  ;;  %1924 = vmatpush.msra.mxu3 %v1194_v32  ;;  %v2953_v54 = vunpack.i.l.bf16 %v2952_v25  ;;  %v2954_v56 = vunpack.i.h.bf16 %v2952_v25 }
 0x215   : > { %1950 = vmatpush.msrb.mxu2 %v3501_v41  ;;  %2976 = vrot.lane.b32.xlu0 %v4166_v49, %s3101_s17 }
 0x216   : > { %v2947_v50 = vpop.permute.xlu1 %2946  ;;  %1860 = vmatpush.msra.mxu1 %v1509_v12  ;;  %2971 = vrot.lane.b32.xlu2 %v4166_v49, %s3101_s17 }
 0x217   : > { %v2948_v8 = vunpack.i.l.bf16 %v2947_v50  ;;  %1951 = vmatpush.msrb.mxu2 %v3462_v11  ;;  %v2949_v45 = vunpack.i.h.bf16 %v2947_v50 }
 0x218   : > { %v2942_v36 = vpop.permute.xlu0 %2941  ;;  %1861 = vmatpush.msra.mxu1 %v1507_v60 }
 0x219   : > { %v2944_v27 = vunpack.i.h.bf16 %v2942_v36  ;;  %v2943_v41 = vunpack.i.l.bf16 %v2942_v36  ;;  %1952 = vmatpush.msrb.mxu2 %v3474_v28  ;;  %v1664_v11 = vsel %vm436_vm0, %v4157_v5, %v2948_v8  ;;  %v4159_v28 = vunpack.i.h.bf16 %v3633_v46 }
 0x21a   : > { %1862 = vmatpush.msra.mxu1 %v1505_v20  ;;  %1979 = vmatpush.msrb.mxu0 %v1664_v11 }
 0x21b   : > { %1953 = vmatpush.msrb.mxu2 %v3458_v7  ;;  %1848 = vmatmul.f32.gmra.mxu0 %v3863_v3  ;;  %v1192_v48 = vsel %vm375_vm4, %v4158_v42, %v2943_v41  ;;  %v1662_v38 = vsel %vm436_vm0, %v4159_v28, %v2949_v45  ;;  %v1190_v7 = vsel %vm375_vm4, %v2759_v24, %v2944_v27  ;;  %v2967_v18 = vpop.permute.xlu2 %2966 }
 0x21c   : > { %1863 = vmatpush.msra.mxu1 %v3505_v43  ;;  %1925 = vmatpush.msra.mxu3 %v1192_v48  ;;  %v1188_v43 = vsel %vm375_vm4, %v2774_v57, %v2953_v54  ;;  %v4161_v57 = vunpack.i.h.bf16 %v3584_v15  ;;  %v1701_v15 = vld [vmem:[%s4134_s4 + $0x20] sm:$0xff] }
 0x21d   : > { %1954 = vmatpush.msrb.mxu2 %v3456_v6  ;;  %1980 = vmatpush.msrb.mxu0 %v1662_v38  ;;  %v1706_v6 = vld [vmem:[%s4134_s4 + $0x48] sm:$0xff] }
 0x21e   : > { %1864 = vmatpush.msra.mxu1 %v3471_v1  ;;  %1926 = vmatpush.msra.mxu3 %v1190_v7  ;;  %v2962_v53 = vpop.permute.xlu1 %2961 }
 0x21f   : > { %1955 = vmatpush.msrb.mxu2 %v3423_v17  ;;  %v1186_v17 = vsel %vm375_vm4, %v2744_v40, %v2954_v56  ;;  %v2968_v40 = vunpack.i.l.bf16 %v2967_v18 }
 0x220   : > { %v2957_v9 = vpop.permute.xlu0 %2956  ;;  %1865 = vmatpush.msra.mxu1 %v3478_v31  ;;  %1927 = vmatpush.msra.mxu3 %v1188_v43  ;;  %v1698_v31 = vld [vmem:[%s4134_s4 + $0x8] sm:$0xff] }
 0x221   : > { %v2958_v46 = vunpack.i.l.bf16 %v2957_v9  ;;  %1956 = vmatpush.msrb.mxu2 %v3429_v44  ;;  %v2959_v1 = vunpack.i.h.bf16 %v2957_v9  ;;  %v2963_v44 = vunpack.i.l.bf16 %v2962_v53 }
 0x222   : > { %1866 = vmatpush.msra.mxu1 %v3440_v55  ;;  %1928 = vmatpush.msra.mxu3 %v1186_v17  ;;  %v2964_v55 = vunpack.i.h.bf16 %v2962_v53 }
 0x223   : > { %1957 = vmatpush.msrb.mxu2 %v3418_v35  ;;  %1851 = vmatmul.f32.gmra.mxu0 %v1706_v6  ;;  %v1660_v24 = vsel %vm436_vm0, %v4160_v30, %v2958_v46  ;;  %v1658_v35 = vsel %vm436_vm0, %v4161_v57, %v2959_v1  ;;  %v1801_v10 = vpop.permute.xlu2 %1800 }
 0x224   : > { %1929 = vmatmul.f32.vlgmr.msra.gmra.mxu3 %v3815_v2  ;;  %1867 = vmatpush.msra.mxu1 %v3438_v51  ;;  %v1656_v2 = vsel %vm436_vm0, %v4162_v33, %v2963_v44  ;;  %v2969_v51 = vunpack.i.h.bf16 %v2967_v18 }
 0x225   : > { %1981 = vmatpush.msrb.mxu0 %v1660_v24  ;;  %1958 = vmatmul.f32.vlgmr.msrb.gmra.mxu2 %v1698_v31 }
 0x226   : > { %1868 = vmatpush.msra.mxu1 %v3405_v29  ;;  %v1654_v29 = vsel %vm436_vm0, %v4163_v37, %v2964_v55 }
 0x227   : > { %1982 = vmatpush.msrb.mxu0 %v1658_v35 }
 0x228   : > { %1869 = vmatpush.msra.mxu1 %v3414_v13  ;;  %v4164_v13 = vunpack.i.h.bf16 %v3550_v61  ;;  %v1707_v61 = vld [vmem:[%s4134_s4 + $0x50] sm:$0xff]  ;;  %v1811_v27 = vpop.permute.xlu0 %1810 }
 0x229   : > { %1983 = vmatpush.msrb.mxu0 %v1656_v2 }
 0x22a   : > { %1870 = vmatpush.msra.mxu1 %v3416_v34  ;;  %v1652_v26 = vsel %vm436_vm0, %v4164_v13, %v2968_v40  ;;  %v4165_v34 = vunpack.i.h.bf16 %v3577_v14 }
 0x22b   : > { %1984 = vmatpush.msrb.mxu0 %v1654_v29  ;;  %1871 = vmatmul.f32.vlgmr.msra.gmra.mxu1 %v1698_v31 }
 0x22c   : > { %1932 = vmatmul.f32.gmra.mxu3 %v3844_v16  ;;  %v1650_v23 = vsel %vm436_vm0, %v4165_v34, %v2969_v51 }
 0x22d   : > { %1985 = vmatpush.msrb.mxu0 %v1652_v26  ;;  %1961 = vmatmul.f32.gmra.mxu2 %v1701_v15 }
 0x22f   : > { %1986 = vmatpush.msrb.mxu0 %v1650_v23 }
 0x230   : > { %2593 = vmatmul.msk.f32.vlgmr.msrb.gmra.mxu0 %vm1813_vm13, %v3679_v58  ;;  %v1796_v1 = vpop.permute.xlu0 %1795 }
 0x233   : > { %1874 = vmatmul.f32.gmra.mxu1 %v1701_v15 }
 0x234   : > { %1935 = vmatmul.f32.gmra.mxu3 %v3863_v3  ;;  %v1806_v3 = vpop.permute.xlu1 %1805 }
 0x235   : > { %1964 = vmatmul.f32.gmra.mxu2 %v1704_v21 }
 0x238   : > { %2594 = vmatmul.msk.f32.gmra.mxu0 %vm1813_vm13, %v3697_v19 }
 0x23b   : > { %1877 = vmatmul.f32.gmra.mxu1 %v1704_v21 }
 0x23c   : > { %1938 = vmatmul.f32.gmra.mxu3 %v1706_v6 }
 0x23d   : > { %1967 = vmatmul.f32.gmra.mxu2 %v1707_v61 }
 0x240   : > { %2595 = vmatmul.msk.f32.gmra.mxu0 %vm1813_vm13, %v3727_v47 }
 0x243   : > { %1880 = vmatmul.f32.gmra.mxu1 %v1707_v61  ;;  %v2471_v61 = vld [vmem:[%s4138_s8] sm:$0xff] }
 0x248   : > { %2596 = vmatmul.msk.f32.gmra.mxu0 %vm1813_vm13, %v3764_v39 }
 0x26a   : > { %v1901_v14 = vpop.f32.mrf.mxu2 }
 0x272   : > { %v1904_v16 = vpop.f32.mrf.mxu2 }
 0x27a   : > { %v1907_v63 = vpop.f32.mrf.mxu2 }
 0x282   : > { %v1910_v4 = vpop.f32.mrf.mxu2 }
 0x288   : > { %v1843_v58 = vpop.f32.mrf.mxu0 }
 0x289   : > { %v1844_v24 = vadd.f32 %v1843_v58, %v1796_v1  ;;  %v2455_v58 = vld [vmem:[%s4137_s7] sm:$0xff] }
 0x290   : > { %v1846_v19 = vpop.f32.mrf.mxu0 }
 0x291   : > { %v1847_v39 = vadd.f32 %v1846_v19, %v1801_v10  ;;  %v2977_v19 = vpop.permute.xlu0 %2976 }
 0x298   : > { %v1849_v22 = vpop.f32.mrf.mxu0 }
 0x299   : > { %v1850_v41 = vadd.f32 %v1849_v22, %v1806_v3 }
 0x2a0   : > { %v1852_v0 = vpop.f32.mrf.mxu0 }
 0x2a1   : > { %v1853_v9 = vadd.f32 %v1852_v0, %v1811_v27 }
 0x2a7   : > { %v1930_v62 = vpop.f32.mrf.mxu3 }
 0x2a8   : > { %v1872_v47 = vpop.f32.mrf.mxu1  ;;  %v1959_v52 = vpop.f32.mrf.mxu2  ;;  %v1931_v31 = vadd.f32 %v1930_v62, %v1796_v1 }
 0x2a9   : > { %v1873_v55 = vadd.f32 %v1872_v47, %v1844_v24 }
 0x2aa   : > { %v1960_v57 = vadd.f32 %v1959_v52, %v1931_v31 }
 0x2ab   : > { %v3975_v33 = vadd.f32 %v1901_v14, %v1873_v55  ;;  %v2456_v14 = vld [vmem:[%s4137_s7 + $0x8] sm:$0xff] }
 0x2ad   : > { %v1988_v32 = vpop.f32.mrf.mxu0  ;;  %v3035_v15 = vpack.i.bf16 %v3975_v33, %v4166_v49 }
 0x2ae   : > { %v3973_v40 = vadd.f32 %v1988_v32, %v1960_v57 }
 0x2af   : > { %v1933_v59 = vpop.f32.mrf.mxu3 }
 0x2b0   : > { %v1875_v12 = vpop.f32.mrf.mxu1  ;;  %v1962_v8 = vpop.f32.mrf.mxu2  ;;  %v1934_v60 = vadd.f32 %v1933_v59, %v1801_v10  ;;  %v2995_v37 = vpack.i.bf16 %v3973_v40, %v3975_v33 }
 0x2b1   : > { %v1876_v50 = vadd.f32 %v1875_v12, %v1847_v39 }
 0x2b2   : > { %v1963_v20 = vadd.f32 %v1962_v8, %v1934_v60 }
 0x2b3   : > { %v3947_v25 = vadd.f32 %v1904_v16, %v1876_v50  ;;  %v2472_v16 = vld [vmem:[%s4138_s8 + $0x8] sm:$0xff] }
 0x2b5   : > { %v1991_v45 = vpop.f32.mrf.mxu0  ;;  %v2980_v36 = vpack.i.bf16 %v3947_v25, %v4166_v49 }
 0x2b6   : > { %v3952_v54 = vadd.f32 %v1991_v45, %v1963_v20 }
 0x2b7   : > { %2981 = vrot.lane.b32.xlu0 %v2980_v36, %s3099_s15  ;;  %v1936_v5 = vpop.f32.mrf.mxu3 }
 0x2b8   : > { %v1878_v11 = vpop.f32.mrf.mxu1  ;;  %v1937_v48 = vadd.f32 %v1936_v5, %v1806_v3  ;;  %v1965_v38 = vpop.f32.mrf.mxu2  ;;  %v3000_v7 = vpack.i.bf16 %v3952_v54, %v3947_v25  ;;  %v3055_v23 = vpack.i.bf16 %v3973_v40, %v3952_v54 }
 0x2b9   : > { %v1879_v42 = vadd.f32 %v1878_v11, %v1850_v41 }
 0x2ba   : > { %v1966_v6 = vadd.f32 %v1965_v38, %v1937_v48 }
 0x2bb   : > { %v3954_v28 = vadd.f32 %v1907_v63, %v1879_v42 }
 0x2bd   : > { %v2985_v56 = vpack.i.bf16 %v3954_v28, %v4166_v49  ;;  %v1994_v43 = vpop.f32.mrf.mxu0 }
 0x2be   : > { %v3962_v46 = vadd.f32 %v1994_v43, %v1966_v6  ;;  %v2979_v6 = vunpack.i.h.bf16 %v2977_v19 }
 0x2bf   : > { %2986 = vrot.lane.b32.xlu2 %v2985_v56, %s3099_s15  ;;  %3001 = vrot.lane.b32.xlu0 %v3000_v7, %s3101_s17  ;;  %v1939_v35 = vpop.f32.mrf.mxu3 }
 0x2c0   : > { %v1881_v53 = vpop.f32.mrf.mxu1  ;;  %v3005_v18 = vpack.i.bf16 %v3962_v46, %v3954_v28  ;;  %v1940_v2 = vadd.f32 %v1939_v35, %v1811_v27  ;;  %v1968_v51 = vpop.f32.mrf.mxu2  ;;  %v2978_v27 = vunpack.i.l.bf16 %v2977_v19 }
 0x2c1   : > { %v1882_v17 = vadd.f32 %v1881_v53, %v1853_v9 }
 0x2c2   : > { %v1969_v13 = vadd.f32 %v1968_v51, %v1940_v2 }
 0x2c3   : > { %v3964_v30 = vadd.f32 %v1910_v4, %v1882_v17 }
 0x2c5   : > { %v2990_v44 = vpack.i.bf16 %v3964_v30, %v4166_v49  ;;  %v1997_v29 = vpop.f32.mrf.mxu0 }
 0x2c6   : > { %v3984_v26 = vadd.f32 %v1997_v29, %v1969_v13 }
 0x2c7   : > { %2991 = vrot.lane.b32.xlu1 %v2990_v44, %s3099_s15  ;;  %3006 = vrot.lane.b32.xlu2 %v3005_v18, %s3101_s17 }
 0x2c8   : > { %3026 = vrot.lane.b32.xlu0 %v2985_v56, %s3100_s16  ;;  %v3010_v34 = vpack.i.bf16 %v3984_v26, %v3964_v30  ;;  %v3060_v21 = vpack.i.bf16 %v3962_v46, %v3984_v26 }
 0x2cf   : > { %3021 = vrot.lane.b32.xlu2 %v2990_v44, %s3100_s16  ;;  %2996 = vrot.lane.b32.xlu1 %v2995_v37, %s3101_s17 }
 0x2d0   : > { %3036 = vrot.lane.b32.xlu0 %v3035_v15, %s3100_s16 }
 0x2d7   : > { %3031 = vrot.lane.b32.xlu2 %v2980_v36, %s3100_s16  ;;  %3011 = vrot.lane.b32.xlu1 %v3010_v34, %s3101_s17  ;;  %s332_s17 = scalar_lea.vmem %s4139_s9, %s2604_s29 }
 0x2d8   : > { %3066 = vrot.lane.b32.xlu0 %v3010_v34, %s3103_s19 }
 0x2df   : > { %3056 = vrot.lane.b32.xlu2 %v3055_v23, %s3100_s16  ;;  %3016 = vrot.lane.b32.xlu1 %v3035_v15, %s3099_s15 }
 0x2e0   : > { %3071 = vrot.lane.b32.xlu0 %v3000_v7, %s3103_s19 }
 0x2e7   : > { %3061 = vrot.lane.b32.xlu2 %v3060_v21, %s3100_s16  ;;  %3041 = vrot.lane.b32.xlu1 %v3055_v23, %s3099_s15 }
 0x2e8   : > { %3086 = vrot.lane.b32.xlu0 %v4166_v49, %s3103_s19 }
 0x2ef   : > { %3081 = vrot.lane.b32.xlu2 %v4166_v49, %s3103_s19  ;;  %3046 = vrot.lane.b32.xlu1 %v3060_v21, %s3099_s15  ;;  %v2972_v49 = vpop.permute.xlu2 %2971 }
 0x2f0   : > { %2475 = vperm.xlu0 %2734, %v2471_v61   ;;  %v2974_v59 = vunpack.i.h.bf16 %v2972_v49  ;;  %v2973_v12 = vunpack.i.l.bf16 %v2972_v49 }
 0x2f7   : > { %2464 = vperm.xlu2 %2733, %v2456_v14   ;;  %3051 = vrot.lane.b32.xlu1 %v3005_v18, %s3103_s19 }
 0x2ff   : > { %3076 = vrot.lane.b32.xlu1 %v2995_v37, %s3103_s19 }
 0x307   : > { %2459 = vperm.xlu1 %2732, %v2455_v58  }
 0x30f   : > { %2480 = vperm.xlu1 %2732, %v2472_v16  }
 0x319   : > { %v4019_v63 = vpop.permute.xlu2 %2986 }
 0x31a   : > { %v2989_v35 = vunpack.i.h.bf16 %v4019_v63  ;;  %v2988_v2 = vunpack.i.l.bf16 %v4019_v63 }
 0x31c   : > { %v2132_v37 = vsel %vm394_vm3, %v2988_v2, %v2989_v35  ;;  %v2315_v2 = vld [vmem:[%s4136_s6 + $0x18] sm:$0xff] }
 0x321   : > { %v3007_v0 = vpop.permute.xlu2 %3006 }
 0x322   : > { %v3009_v8 = vunpack.i.h.bf16 %v3007_v0  ;;  %v3008_v60 = vunpack.i.l.bf16 %v3007_v0 }
 0x324   : > { %v2220_v43 = vsel %vm417_vm2, %v3008_v60, %v3009_v8  ;;  %v2221_v9 = vsel %vm417_vm2, %v3009_v8, %v2974_v59 }
 0x329   : > { %v4021_v22 = vpop.permute.xlu0 %2981  ;;  %v4027_v52 = vpop.permute.xlu2 %3021 }
 0x32a   : > { %v3024_v29 = vunpack.i.h.bf16 %v4027_v52  ;;  %v3023_v15 = vunpack.i.l.bf16 %v4027_v52 }
 0x32c   : > { %v2062_v14 = vsel %vm375_vm4, %v3023_v15, %v3024_v29 }
 0x331   : > { %v3002_v4 = vpop.permute.xlu0 %3001  ;;  %v4031_v39 = vpop.permute.xlu2 %3031 }
 0x332   : > { %v3004_v5 = vunpack.i.h.bf16 %v3002_v4  ;;  %v3003_v11 = vunpack.i.l.bf16 %v3002_v4  ;;  %v3034_v58 = vunpack.i.h.bf16 %v4031_v39  ;;  %v3033_v16 = vunpack.i.l.bf16 %v4031_v39 }
 0x334   : > { %v2218_v53 = vsel %vm417_vm2, %v3003_v11, %v3004_v5  ;;  %v2219_v17 = vsel %vm417_vm2, %v3004_v5, %v2978_v27  ;;  %v2058_v39 = vsel %vm375_vm4, %v3033_v16, %v3034_v58 }
 0x339   : > { %v4023_v62 = vpop.permute.xlu1 %2991  ;;  %v4046_v1 = vpop.permute.xlu2 %3056 }
 0x33a   : > { %v4025_v47 = vpop.permute.xlu0 %3026  ;;  %v2994_v18 = vunpack.i.h.bf16 %v4023_v62  ;;  %v2993_v55 = vunpack.i.l.bf16 %v4023_v62 }
 0x33b   : > { %v3029_v13 = vunpack.i.h.bf16 %v4025_v47  ;;  %v3028_v34 = vunpack.i.l.bf16 %v4025_v47 }
 0x33c   : > { %v2134_v51 = vsel %vm394_vm3, %v2993_v55, %v2994_v18 }
 0x33d   : > { %v2060_v62 = vsel %vm375_vm4, %v3028_v34, %v3029_v13 }
 0x341   : > { %v2997_v32 = vpop.permute.xlu1 %2996 }
 0x342   : > { %v4029_v10 = vpop.permute.xlu0 %3036  ;;  %v2999_v56 = vunpack.i.h.bf16 %v2997_v32  ;;  %v2998_v7 = vunpack.i.l.bf16 %v2997_v32 }
 0x343   : > { %v3039_v63 = vunpack.i.h.bf16 %v4029_v10 }
 0x344   : > { %v2216_v24 = vsel %vm417_vm2, %v2998_v7, %v2999_v56  ;;  %v2217_v44 = vsel %vm417_vm2, %v2999_v56, %v2979_v6  ;;  %v3058_v7 = vunpack.i.l.bf16 %v4046_v1 }
 0x349   : > { %v3012_v50 = vpop.permute.xlu1 %3011 }
 0x34a   : > { %v4033_v45 = vpop.permute.xlu0 %3066  ;;  %v3014_v36 = vunpack.i.h.bf16 %v3012_v50  ;;  %v3013_v3 = vunpack.i.l.bf16 %v3012_v50 }
 0x34b   : > { %v3069_v41 = vunpack.i.h.bf16 %v4033_v45  ;;  %v3068_v20 = vunpack.i.l.bf16 %v4033_v45 }
 0x34c   : > { %v2222_v42 = vsel %vm417_vm2, %v3013_v3, %v3014_v36  ;;  %v2223_v48 = vsel %vm417_vm2, %v3014_v36, %v2973_v12  ;;  %v2312_v36 = vld [vmem:[%s4136_s6] sm:$0xff] }
 0x34d   : > { %2363 = vmatpush.msrb.mxu1 %v2222_v42  ;;  %v2294_v38 = vsel %vm436_vm0, %v3068_v20, %v3069_v41  ;;  %2409 = vmatpush.msra.mxu2 %v2223_v48 }
 0x34e   : > { %2398 = vmatpush.msrb.mxu3 %v2294_v38 }
 0x34f   : > { %2364 = vmatpush.msrb.mxu1 %v2220_v43  ;;  %2410 = vmatpush.msra.mxu2 %v2221_v9 }
 0x351   : > { %v4048_v31 = vpop.permute.xlu1 %3016  ;;  %2365 = vmatpush.msrb.mxu1 %v2218_v53  ;;  %2411 = vmatpush.msra.mxu2 %v2219_v17  ;;  %v3059_v53 = vunpack.i.h.bf16 %v4046_v1 }
 0x353   : > { %2366 = vmatpush.msrb.mxu1 %v2216_v24  ;;  %2412 = vmatpush.msra.mxu2 %v2217_v44  ;;  %v2314_v24 = vld [vmem:[%s4136_s6 + $0x10] sm:$0xff]  ;;  %v2057_v55 = vsel %vm375_vm4, %v3039_v63, %v3059_v53 }
 0x355   : > { %2367 = vmatpush.msrb.mxu1 %v3964_v30  ;;  %2413 = vmatpush.msra.mxu2 %v3984_v26  ;;  %v4062_v30 = vpop.permute.xlu2 %3061 }
 0x356   : > { %v3063_v12 = vunpack.i.l.bf16 %v4062_v30  ;;  %v3064_v11 = vunpack.i.h.bf16 %v4062_v30 }
 0x357   : > { %2368 = vmatpush.msrb.mxu1 %v3954_v28  ;;  %2414 = vmatpush.msra.mxu2 %v3962_v46  ;;  %v2984_v28 = vunpack.i.h.bf16 %v4021_v22  ;;  %v2983_v46 = vunpack.i.l.bf16 %v4021_v22  ;;  %v3038_v22 = vunpack.i.l.bf16 %v4029_v10 }
 0x358   : > { %v2063_v43 = vsel %vm375_vm4, %v3024_v29, %v3063_v12  ;;  %v2061_v6 = vsel %vm375_vm4, %v3029_v13, %v3064_v11 }
 0x359   : > { %v3042_v57 = vpop.permute.xlu1 %3041  ;;  %2369 = vmatpush.msrb.mxu1 %v3947_v25  ;;  %2415 = vmatpush.msra.mxu2 %v3952_v54  ;;  %v3019_v25 = vunpack.i.h.bf16 %v4048_v31  ;;  %v3018_v54 = vunpack.i.l.bf16 %v4048_v31  ;;  %v2056_v60 = vsel %vm375_vm4, %v3038_v22, %v3039_v63  ;;  %v2059_v31 = vsel %vm375_vm4, %v3034_v58, %v3058_v7 }
 0x35a   : > { %v3043_v49 = vunpack.i.l.bf16 %v3042_v57  ;;  %v3044_v0 = vunpack.i.h.bf16 %v3042_v57  ;;  %v2313_v57 = vld [vmem:[%s4136_s6 + $0x8] sm:$0xff] }
 0x35b   : > { %2370 = vmatpush.msrb.mxu1 %v3975_v33  ;;  %2416 = vmatpush.msra.mxu2 %v3973_v40  ;;  %v4074_v33 = vpop.permute.xlu0 %3071  ;;  %v2130_v40 = vsel %vm394_vm3, %v2983_v46, %v2984_v28  ;;  %v2128_v61 = vsel %vm394_vm3, %v3018_v54, %v3019_v25 }
 0x35c   : > { %v2131_v59 = vsel %vm394_vm3, %v2984_v28, %v3043_v49  ;;  %v3074_v10 = vunpack.i.h.bf16 %v4074_v33  ;;  %v3073_v3 = vunpack.i.l.bf16 %v4074_v33  ;;  %v2129_v5 = vsel %vm394_vm3, %v3019_v25, %v3044_v0 }
 0x35d   : > { %2371 = vmatpush.msrb.mxu1 %v2134_v51  ;;  %v3082_v4 = vpop.permute.xlu2 %3081 }
 0x35e   : > { %v3084_v52 = vunpack.i.h.bf16 %v3082_v4  ;;  %v3083_v32 = vunpack.i.l.bf16 %v3082_v4  ;;  %v2290_v9 = vsel %vm436_vm0, %v3073_v3, %v3074_v10 }
 0x35f   : > { %2372 = vmatpush.msrb.mxu1 %v2132_v37 }
 0x360   : > { %v2295_v48 = vsel %vm436_vm0, %v3069_v41, %v3083_v32 }
 0x361   : > { %v3047_v26 = vpop.permute.xlu1 %3046  ;;  %2373 = vmatpush.msrb.mxu1 %v2130_v40 }
 0x362   : > { %v3049_v23 = vunpack.i.h.bf16 %v3047_v26  ;;  %v3048_v21 = vunpack.i.l.bf16 %v3047_v26 }
 0x363   : > { %2374 = vmatpush.msrb.mxu1 %v2128_v61  ;;  %v3087_v50 = vpop.permute.xlu0 %3086 }
 0x364   : > { %v2135_v19 = vsel %vm394_vm3, %v2994_v18, %v3048_v21  ;;  %v2133_v47 = vsel %vm394_vm3, %v2989_v35, %v3049_v23  ;;  %v3088_v42 = vunpack.i.l.bf16 %v3087_v50  ;;  %v3089_v45 = vunpack.i.h.bf16 %v3087_v50 }
 0x365   : > { %2375 = vmatpush.msrb.mxu1 %v2062_v14  ;;  %2417 = vmatpush.msra.mxu2 %v2135_v19  ;;  %v2465_v14 = vpop.permute.xlu2 %2464 }
 0x366   : > { %v2291_v41 = vsel %vm436_vm0, %v3074_v10, %v3088_v42 }
 0x367   : > { %2376 = vmatpush.msrb.mxu1 %v2060_v62  ;;  %2418 = vmatpush.msra.mxu2 %v2133_v47 }
 0x369   : > { %v3052_v8 = vpop.permute.xlu1 %3051  ;;  %2377 = vmatpush.msrb.mxu1 %v2058_v39  ;;  %2419 = vmatpush.msra.mxu2 %v2131_v59 }
 0x36a   : > { %v3054_v27 = vunpack.i.h.bf16 %v3052_v8  ;;  %v3053_v20 = vunpack.i.l.bf16 %v3052_v8 }
 0x36b   : > { %2378 = vmatpush.msrb.mxu1 %v2056_v60  ;;  %2420 = vmatpush.msra.mxu2 %v2129_v5  ;;  %v2476_v33 = vpop.permute.xlu0 %2475 }
 0x36c   : > { %2379 = vmatmul.f32.vlgmr.msrb.gmra.mxu1 %v2312_v36  ;;  %v2292_v38 = vsel %vm436_vm0, %v3053_v20, %v3054_v27  ;;  %v2293_v56 = vsel %vm436_vm0, %v3054_v27, %v3084_v52 }
 0x36d   : > { %2444 = vmatpush.msra.mxu1 %v2295_v48  ;;  %2399 = vmatpush.msrb.mxu3 %v2292_v38 }
 0x36e   : > { %2421 = vmatpush.msra.mxu2 %v2063_v43 }
 0x36f   : > { %2445 = vmatpush.msra.mxu1 %v2293_v56  ;;  %2400 = vmatpush.msrb.mxu3 %v2290_v9 }
 0x370   : > { %2422 = vmatpush.msra.mxu2 %v2061_v6 }
 0x371   : > { %2446 = vmatpush.msra.mxu1 %v2291_v41  ;;  %v3077_v17 = vpop.permute.xlu1 %3076 }
 0x372   : > { %v3079_v44 = vunpack.i.h.bf16 %v3077_v17  ;;  %v3078_v18 = vunpack.i.l.bf16 %v3077_v17  ;;  %2423 = vmatpush.msra.mxu2 %v2059_v31 }
 0x374   : > { %2424 = vmatpush.msra.mxu2 %v2057_v55  ;;  %2382 = vmatmul.f32.gmra.mxu1 %v2314_v24  ;;  %v2288_v1 = vsel %vm436_vm0, %v3078_v18, %v3079_v44  ;;  %v2289_v35 = vsel %vm436_vm0, %v3079_v44, %v3089_v45 }
 0x375   : > { %2401 = vmatpush.msrb.mxu3 %v2288_v1  ;;  %2447 = vmatpush.msra.mxu1 %v2289_v35 }
 0x376   : > { %2597 = vmatmul.msk.f32.vlgmr.msrb.gmra.mxu3 %vm2356_vm14, %v2313_v57  ;;  %2425 = vmatmul.f32.vlgmr.msra.gmra.mxu2 %v2312_v36 }
 0x379   : > { %v2460_v37 = vpop.permute.xlu1 %2459 }
 0x37c   : > { %2599 = vmatmul.msk.f32.vlgmr.msra.gmra.mxu1 %vm2356_vm14, %v2313_v57 }
 0x37e   : > { %2598 = vmatmul.msk.f32.gmra.mxu3 %vm2356_vm14, %v2315_v2  ;;  %2428 = vmatmul.f32.gmra.mxu2 %v2314_v24 }
 0x381   : > { %v2481_v49 = vpop.permute.xlu1 %2480 }
 0x384   : > { %2600 = vmatmul.msk.f32.gmra.mxu1 %vm2356_vm14, %v2315_v2 }
 0x3e9   : > { %v2380_v30 = vpop.f32.mrf.mxu1 }
 0x3f1   : > { %v2383_v28 = vpop.f32.mrf.mxu1 }
 0x3f9   : > { %v2403_v46 = vpop.f32.mrf.mxu3  ;;  %v2426_v51 = vpop.f32.mrf.mxu2 }
 0x3fa   : > { %v2404_v25 = vadd.f32 %v2403_v46, %v2380_v30  ;;  %v2449_v54 = vpop.f32.mrf.mxu1 }
 0x3fb   : > { %v2450_v29 = vadd.f32 %v2449_v54, %v2426_v51 }
 0x3fc   : > { %v2467_v15 = vmul.f32 %v2460_v37, %v2404_v25 }
 0x3fd   : > { %v2468_v40 = vmul.f32 %v2460_v37, %v2450_v29 }
 0x3fe   : > { %v2483_v13 = vadd.f32 %v2476_v33, %v2467_v15 }
 0x3ff   : > { %v2484_v26 = vadd.f32 %v2476_v33, %v2468_v40 }
 0x400   : > { %2487 = vst [vmem:[%s332_s17] sm:$0xff] %v2483_v13 }
 0x401   : > { %2488 = vst [vmem:[%s332_s17 + $0x8] sm:$0xff] %v2484_v26  ;;  %v2406_v34 = vpop.f32.mrf.mxu3  ;;  %v2429_v23 = vpop.f32.mrf.mxu2 }
 0x402   : > { %v2407_v21 = vadd.f32 %v2406_v34, %v2383_v28  ;;  %v2452_v61 = vpop.f32.mrf.mxu1 }
 0x403   : > { %v2453_v58 = vadd.f32 %v2452_v61, %v2429_v23 }
 0x404   : > { %v2469_v16 = vmul.f32 %v2465_v14, %v2407_v21 }
 0x405   : > { %v2470_v19 = vmul.f32 %v2465_v14, %v2453_v58 }
 0x406   : > { %v2485_v63 = vadd.f32 %v2481_v49, %v2469_v16 }
 0x407   : > { %v2486_v22 = vadd.f32 %v2481_v49, %v2470_v19 }
 0x408   : > { %2489 = vst [vmem:[%s332_s17 + $0x10] sm:$0xff] %v2485_v63 }
 0x409   : > { %2490 = vst [vmem:[%s332_s17 + $0x18] sm:$0xff] %v2486_v22 }
 0x40a PF: > { %s19_s30 = sadd.s32 1, %s3096_s30  }
 0x40b   : > { %p16_p4 = scmp.ge.s32.totalorder %s19_s30, 4  }
 0x40d   :  { %18 = sbr.rel (!%p16_p4) target bundleno = 1 (0x1), region = 95 }

</bundles_post_ra>
